<compile_context>
chip_gen: v7x
topology: tpu7x:2x2x1
jax: 0.10.0
libtpu: 0.0.40
codegen_flags: <defaults>
</compile_context>

<pallas_src>
import functools
import math

import jax
import jax.numpy as jnp
from jax.experimental import pallas as pl
from jax.experimental.pallas import tpu as pltpu


BN_EPS = 1e-5
# True  -> PyTorch train()-mode BatchNorm forward (batch statistics).
# False -> PyTorch eval()-mode with fresh running stats (mean=0, var=1),
#          folded into the conv weights at trace time.
BN_USE_BATCH_STATS = True
# TODO(synk): BatchNorm running-stat (momentum) buffer updates are not modeled;
# only the forward normalization is reproduced.


# ----------------------------------------------------------------------------
# Fused per-block Pallas kernel:
#   for each branch i:  conv_i(pooled_i) (+bias) -> BN -> ReLU
#   chpool:             sum_i h_i @ Wp_i + bp
#   (last block only):  condenser conv over the full length -> (B, z)
# All activations are position-major 2-D:  row index = l * B + b.
# ----------------------------------------------------------------------------
def _inception_block_kernel(*refs, ks, Lp, B, bn_batch_stats, fuse_condenser):
    if fuse_condenser:
        (x1, x2, x3, w1, w2, w3, b1, b2, b3, wp, bp, wc, bc, o_ref) = refs
    else:
        (x1, x2, x3, w1, w2, w3, b1, b2, b3, wp, bp, o_ref) = refs

    M = Lp * B  # rows of the (flattened) block activation

    def branch(x_ref, w_ref, b_ref, k):
        # conv as k accumulated matmuls on row-shifted slices of the padded
        # (zero-padded along L) position-major input.
        acc = jnp.dot(x_ref[0:M, :], w_ref[0],
                      preferred_element_type=jnp.float32)
        for t in range(1, k):
            acc = acc + jnp.dot(x_ref[t * B:t * B + M, :], w_ref[t],
                                preferred_element_type=jnp.float32)
        acc = acc + b_ref[...]  # conv bias (cancels under batch-stat BN)
        if bn_batch_stats:
            # BatchNorm1d train-mode forward: per-channel batch mean / biased
            # variance over all (b, l) rows; gamma=1, beta=0.
            mu = jnp.mean(acc, axis=0, keepdims=True)
            var = jnp.mean(jnp.square(acc - mu), axis=0, keepdims=True)
            acc = (acc - mu) * jax.lax.rsqrt(var + BN_EPS)
        # (eval mode: 1/sqrt(1+eps) already folded into w/b in the wrapper)
        return jnp.maximum(acc, 0.0)

    h1 = branch(x1, w1, b1, ks[0])
    h2 = branch(x2, w2, b2, ks[1])
    h3 = branch(x3, w3, b3, ks[2])

    # 1x1 channel-pooling conv == sum of three matmuls (no concat needed).
    y = (jnp.dot(h1, wp[0], preferred_element_type=jnp.float32)
         + jnp.dot(h2, wp[1], preferred_element_type=jnp.float32)
         + jnp.dot(h3, wp[2], preferred_element_type=jnp.float32)
         + bp[...])

    if fuse_condenser:
        # Condenser Conv1d(C_last -> z, kernel_size = Lp): full contraction
        # over (l, c).  Rows for position l are the contiguous block
        # y[l*B:(l+1)*B, :] thanks to the position-major layout.
        z = wc.shape[2]
        out = jnp.zeros((B, z), jnp.float32)
        for l in range(Lp):
            out = out + jnp.dot(y[l * B:(l + 1) * B, :], wc[l],
                                preferred_element_type=jnp.float32)
        o_ref[...] = out + bc[...]
    else:
        o_ref[...] = y


def _full_spec(shape):
    nd = len(shape)
    return pl.BlockSpec(shape, lambda i, nd=nd: (0,) * nd)


def inception_block_pallas(xs, ws, bs, wp_arr, bp_arr, ks, Lp, B, Cout,
                           bn_batch_stats, condenser=None):
    """One fused pallas_call for a whole InceptionBlock (+ optional condenser)."""
    fuse = condenser is not None
    inputs = list(xs) + list(ws) + list(bs) + [wp_arr, bp_arr]
    if fuse:
        wc_arr, bc_arr = condenser
        inputs += [wc_arr, bc_arr]
        out_shape = jax.ShapeDtypeStruct((B, wc_arr.shape[2]), jnp.float32)
    else:
        out_shape = jax.ShapeDtypeStruct((Lp * B, Cout), jnp.float32)

    inputs = [a.astype(jnp.float32) for a in inputs]
    kernel = functools.partial(
        _inception_block_kernel, ks=tuple(ks), Lp=Lp, B=B,
        bn_batch_stats=bn_batch_stats, fuse_condenser=fuse)

    return pl.pallas_call(
        kernel,
        out_shape=out_shape,
        grid=(1,),
        in_specs=[_full_spec(a.shape) for a in inputs],
        out_specs=_full_spec(out_shape.shape),
        compiler_params=pltpu.CompilerParams(
            dimension_semantics=("arbitrary",)),
    )(*inputs)


# ----------------------------------------------------------------------------
# Glue (plain XLA, tiny tensors): reflect-pad SAME average pooling and the
# zero padding / layout prep for the fused kernel.
# ----------------------------------------------------------------------------
def avg_pool_same(x, k, stride):
    """MyAvgPool1dPadSame along axis 0.  x: (L, B, C) -> (ceil(L/stride), B, C)."""
    L = x.shape[0]
    out_dim = (L + stride - 1) // stride
    p = max(0, (out_dim - 1) * stride + k - L)
    pad_l, pad_r = p // 2, p - p // 2
    # torch reflect padding requires pad < input length
    assert max(pad_l, pad_r) < L, "reflect pad wider than the pooled length"
    xp = jnp.pad(x, ((pad_l, pad_r), (0, 0), (0, 0)), mode="reflect") if p else x
    end = (out_dim - 1) * stride + 1
    acc = xp[0:end:stride]
    for t in range(1, k):
        acc = acc + xp[t:t + end:stride]
    return acc / float(k)


# ----------------------------------------------------------------------------
# Deterministic parameter construction (PyTorch Conv1d default-init shapes)
# ----------------------------------------------------------------------------
def make_conv_params(key, cout, cin, k):
    kw, kb = jax.random.split(key)
    bound = 1.0 / math.sqrt(cin * k)
    w = jax.random.uniform(kw, (cout, cin, k), jnp.float32, -bound, bound)
    b = jax.random.uniform(kb, (cout,), jnp.float32, -bound, bound)
    return w, b


def init_encoder_params(key, tp):
    in_ch = tp["data_dimensions"][0]
    out_ch = tp["channel_n"]
    stride = tp["stride"]
    n_block = tp["n_block"]
    ks = [tp["kernels"]["k1"], tp["kernels"]["k2"], tp["kernels"]["k3"]]
    last_dim = tp["data_dimensions"][1]
    z_dim = tp["bottleneck_dim"]

    blocks = []
    for _ in range(n_block):
        key, k1, k2, k3, k4 = jax.random.split(key, 5)
        branches = []
        for bk, k in zip((k1, k2, k3), ks):
            w, b = make_conv_params(bk, out_ch, in_ch, k)
            branches.append((w, b, k))
        wp, bp = make_conv_params(k4, out_ch, out_ch * 3, 1)
        blocks.append({"branches": branches, "chpool": (wp, bp)})
        in_ch = out_ch
        out_ch = out_ch * 2
        last_dim = int(math.ceil(last_dim / stride))

    key, kc = jax.random.split(key)
    wc, bc = make_conv_params(kc, z_dim, in_ch, last_dim)
    return {"blocks": blocks, "condenser": (wc, bc), "last_dim": last_dim}


# ----------------------------------------------------------------------------
# Encoder forward: n_block fused Pallas launches total (condenser is fused
# into the last one).
# ----------------------------------------------------------------------------
def encoder_forward(params, tp, x_ncl):
    stride = tp["stride"]
    B = x_ncl.shape[0]
    # NCL -> position-major (L, B, C)
    x = jnp.transpose(x_ncl.astype(jnp.float32), (2, 0, 1))

    n_block = len(params["blocks"])
    eval_scale = 1.0 / math.sqrt(1.0 + BN_EPS)

    for i, blk in enumerate(params["blocks"]):
        last = (i == n_block - 1)
        L = x.shape[0]
        Lp = (L + stride - 1) // stride

        xs, ws, bs, ks = [], [], [], []
        for (w, b, k) in blk["branches"]:
            xp = avg_pool_same(x, k, stride)                    # (Lp, B, Cin)
            p = k // 2
            xp = jnp.pad(xp, ((p, p), (0, 0), (0, 0)))          # zero pad (conv SAME)
            xs.append(xp.reshape((Lp + 2 * p) * B, -1))         # rows = l*B + b
            w_arr = jnp.transpose(w, (2, 1, 0))                 # (k, Cin, Cout)
            b_arr = b.reshape(1, -1)
            if not BN_USE_BATCH_STATS:
                # eval-mode BN (fresh running stats) folded into conv weights
                w_arr = w_arr * eval_scale
                b_arr = b_arr * eval_scale
            ws.append(w_arr)
            bs.append(b_arr)
            ks.append(k)

        wp, bp = blk["chpool"]
        Cout = wp.shape[0]
        wp_arr = jnp.transpose(wp[:, :, 0], (1, 0)).reshape(3, Cout, Cout)
        bp_arr = bp.reshape(1, Cout)

        condenser = None
        if last:
            wc, bc = params["condenser"]
            condenser = (jnp.transpose(wc, (2, 1, 0)),          # (Lp, C_last, z)
                         bc.reshape(1, -1))

        y = inception_block_pallas(xs, ws, bs, wp_arr, bp_arr, ks, Lp, B, Cout,
                                   BN_USE_BATCH_STATS, condenser)
        if last:
            return y[:, :, None]                                # (B, z, 1)
        x = y.reshape(Lp, B, Cout)                              # back to (L, B, C)


# ----------------------------------------------------------------------------
if __name__ == "__main__":
    training_params = {
        "data_dimensions": (4, 16),   # (input_channel, input_dim)
        "channel_n": 8,
        "stride": 2,
        "n_block": 2,
        "kernels": {"k1": 1, "k2": 3, "k3": 5},
        "bottleneck_dim": 32,
        "model_name": "CNNlight",
        "verbose": False,
    }

    root = jax.random.PRNGKey(0)
    k_params, k_x = jax.random.split(root)
    params = init_encoder_params(k_params, training_params)

    # x in PyTorch layout (B, C, L)
    x = jax.random.normal(k_x, (2, 4, 16), jnp.float32)

    fwd = jax.jit(lambda inp: encoder_forward(params, training_params, inp))
    out = jax.block_until_ready(fwd(x))

    assert out.shape == (2, training_params["bottleneck_dim"], 1), out.shape
    assert bool(jnp.all(jnp.isfinite(out)))
    print("KERNEL_OK")
</pallas_src>

<mosaic_0001>
module attributes {stable_mosaic.version = 11 : i64} {
  func.func @_inception_block_kernel(%arg0: i32, %arg1: memref<16x4xf32, #tpu.memory_space<vmem>>, %arg2: memref<20x4xf32, #tpu.memory_space<vmem>>, %arg3: memref<24x4xf32, #tpu.memory_space<vmem>>, %arg4: memref<1x4x8xf32, #tpu.memory_space<vmem>>, %arg5: memref<3x4x8xf32, #tpu.memory_space<vmem>>, %arg6: memref<5x4x8xf32, #tpu.memory_space<vmem>>, %arg7: memref<1x8xf32, #tpu.memory_space<vmem>>, %arg8: memref<1x8xf32, #tpu.memory_space<vmem>>, %arg9: memref<1x8xf32, #tpu.memory_space<vmem>>, %arg10: memref<3x8x8xf32, #tpu.memory_space<vmem>>, %arg11: memref<1x8xf32, #tpu.memory_space<vmem>>, %arg12: memref<16x8xf32, #tpu.memory_space<vmem>>) attributes {dimension_semantics = [#tpu.dimension_semantics<arbitrary>], iteration_bounds = array<i64: 1>, scalar_prefetch = 0 : i64, scratch_operands = 0 : i64, tpu.core_type = #tpu.core_type<tc>, window_params = [{pipeline_mode = #tpu.pipeline_mode<synchronous>, transform_indices = @transform_0, window_bounds = array<i64: 16, 4>}, {pipeline_mode = #tpu.pipeline_mode<synchronous>, transform_indices = @transform_1, window_bounds = array<i64: 20, 4>}, {pipeline_mode = #tpu.pipeline_mode<synchronous>, transform_indices = @transform_2, window_bounds = array<i64: 24, 4>}, {pipeline_mode = #tpu.pipeline_mode<synchronous>, transform_indices = @transform_3, window_bounds = array<i64: 1, 4, 8>}, {pipeline_mode = #tpu.pipeline_mode<synchronous>, transform_indices = @transform_4, window_bounds = array<i64: 3, 4, 8>}, {pipeline_mode = #tpu.pipeline_mode<synchronous>, transform_indices = @transform_5, window_bounds = array<i64: 5, 4, 8>}, {pipeline_mode = #tpu.pipeline_mode<synchronous>, transform_indices = @transform_6, window_bounds = array<i64: 1, 8>}, {pipeline_mode = #tpu.pipeline_mode<synchronous>, transform_indices = @transform_7, window_bounds = array<i64: 1, 8>}, {pipeline_mode = #tpu.pipeline_mode<synchronous>, transform_indices = @transform_8, window_bounds = array<i64: 1, 8>}, {pipeline_mode = #tpu.pipeline_mode<synchronous>, transform_indices = @transform_9, window_bounds = array<i64: 3, 8, 8>}, {pipeline_mode = #tpu.pipeline_mode<synchronous>, transform_indices = @transform_10, window_bounds = array<i64: 1, 8>}, {pipeline_mode = #tpu.pipeline_mode<synchronous>, transform_indices = @transform_11, window_bounds = array<i64: 16, 8>}]} {
    %c0 = arith.constant 0 : index
    %c0_0 = arith.constant 0 : index
    %0 = vector.load %arg1[%c0, %c0_0] : memref<16x4xf32, #tpu.memory_space<vmem>>, vector<16x4xf32>
    %c0_1 = arith.constant 0 : index
    %c0_2 = arith.constant 0 : index
    %c0_3 = arith.constant 0 : index
    %1 = vector.load %arg4[%c0_1, %c0_2, %c0_3] : memref<1x4x8xf32, #tpu.memory_space<vmem>>, vector<1x4x8xf32>
    %2 = vector.shape_cast %1 : vector<1x4x8xf32> to vector<4x8xf32>
    %cst = arith.constant dense<0.000000e+00> : vector<16x8xf32>
    %3 = tpu.matmul %0, %2, %cst {dimension_numbers = #tpu.dot_dimension_numbers<[1], [0], [0], [1], [0, 0, 1, 1], [], []>} : vector<16x4xf32>, vector<4x8xf32>, vector<16x8xf32> -> vector<16x8xf32>
    %c0_4 = arith.constant 0 : index
    %c0_5 = arith.constant 0 : index
    %4 = vector.load %arg7[%c0_4, %c0_5] : memref<1x8xf32, #tpu.memory_space<vmem>>, vector<1x8xf32>
    %5 = vector.broadcast %4 : vector<1x8xf32> to vector<16x8xf32>
    %6 = arith.addf %3, %5 : vector<16x8xf32>
    %cst_6 = arith.constant dense<0.000000e+00> : vector<8xf32>
    %7 = vector.multi_reduction <add>, %6, %cst_6 [0] : vector<16x8xf32> to vector<8xf32>
    %8 = vector.shape_cast %7 : vector<8xf32> to vector<1x8xf32>
    %cst_7 = arith.constant 1.600000e+01 : f32
    %9 = vector.broadcast %cst_7 : f32 to vector<1x8xf32>
    %10 = arith.divf %8, %9 : vector<1x8xf32>
    %11 = vector.broadcast %10 : vector<1x8xf32> to vector<16x8xf32>
    %12 = arith.subf %6, %11 : vector<16x8xf32>
    %13 = arith.mulf %12, %12 : vector<16x8xf32>
    %cst_8 = arith.constant dense<0.000000e+00> : vector<8xf32>
    %14 = vector.multi_reduction <add>, %13, %cst_8 [0] : vector<16x8xf32> to vector<8xf32>
    %15 = vector.shape_cast %14 : vector<8xf32> to vector<1x8xf32>
    %cst_9 = arith.constant 1.600000e+01 : f32
    %16 = vector.broadcast %cst_9 : f32 to vector<1x8xf32>
    %17 = arith.divf %15, %16 : vector<1x8xf32>
    %18 = vector.broadcast %10 : vector<1x8xf32> to vector<16x8xf32>
    %19 = arith.subf %6, %18 : vector<16x8xf32>
    %cst_10 = arith.constant 9.99999974E-6 : f32
    %20 = vector.broadcast %cst_10 : f32 to vector<1x8xf32>
    %21 = arith.addf %17, %20 : vector<1x8xf32>
    %22 = math.rsqrt %21 : vector<1x8xf32>
    %23 = vector.broadcast %22 : vector<1x8xf32> to vector<16x8xf32>
    %24 = arith.mulf %19, %23 : vector<16x8xf32>
    %cst_11 = arith.constant 0.000000e+00 : f32
    %25 = vector.broadcast %cst_11 : f32 to vector<16x8xf32>
    %26 = arith.maximumf %24, %25 : vector<16x8xf32>
    %c0_12 = arith.constant 0 : index
    %c0_13 = arith.constant 0 : index
    %27 = vector.load %arg2[%c0_12, %c0_13] : memref<20x4xf32, #tpu.memory_space<vmem>>, vector<16x4xf32>
    %c0_14 = arith.constant 0 : index
    %c0_15 = arith.constant 0 : index
    %c0_16 = arith.constant 0 : index
    %28 = vector.load %arg5[%c0_14, %c0_15, %c0_16] : memref<3x4x8xf32, #tpu.memory_space<vmem>>, vector<1x4x8xf32>
    %29 = vector.shape_cast %28 : vector<1x4x8xf32> to vector<4x8xf32>
    %cst_17 = arith.constant dense<0.000000e+00> : vector<16x8xf32>
    %30 = tpu.matmul %27, %29, %cst_17 {dimension_numbers = #tpu.dot_dimension_numbers<[1], [0], [0], [1], [0, 0, 1, 1], [], []>} : vector<16x4xf32>, vector<4x8xf32>, vector<16x8xf32> -> vector<16x8xf32>
    %c2 = arith.constant 2 : index
    %c0_18 = arith.constant 0 : index
    %31 = vector.load %arg2[%c2, %c0_18] : memref<20x4xf32, #tpu.memory_space<vmem>>, vector<16x4xf32>
    %c1 = arith.constant 1 : index
    %c0_19 = arith.constant 0 : index
    %c0_20 = arith.constant 0 : index
    %32 = vector.load %arg5[%c1, %c0_19, %c0_20] : memref<3x4x8xf32, #tpu.memory_space<vmem>>, vector<1x4x8xf32>
    %33 = vector.shape_cast %32 : vector<1x4x8xf32> to vector<4x8xf32>
    %cst_21 = arith.constant dense<0.000000e+00> : vector<16x8xf32>
    %34 = tpu.matmul %31, %33, %cst_21 {dimension_numbers = #tpu.dot_dimension_numbers<[1], [0], [0], [1], [0, 0, 1, 1], [], []>} : vector<16x4xf32>, vector<4x8xf32>, vector<16x8xf32> -> vector<16x8xf32>
    %35 = arith.addf %30, %34 : vector<16x8xf32>
    %c4 = arith.constant 4 : index
    %c0_22 = arith.constant 0 : index
    %36 = vector.load %arg2[%c4, %c0_22] : memref<20x4xf32, #tpu.memory_space<vmem>>, vector<16x4xf32>
    %c2_23 = arith.constant 2 : index
    %c0_24 = arith.constant 0 : index
    %c0_25 = arith.constant 0 : index
    %37 = vector.load %arg5[%c2_23, %c0_24, %c0_25] : memref<3x4x8xf32, #tpu.memory_space<vmem>>, vector<1x4x8xf32>
    %38 = vector.shape_cast %37 : vector<1x4x8xf32> to vector<4x8xf32>
    %cst_26 = arith.constant dense<0.000000e+00> : vector<16x8xf32>
    %39 = tpu.matmul %36, %38, %cst_26 {dimension_numbers = #tpu.dot_dimension_numbers<[1], [0], [0], [1], [0, 0, 1, 1], [], []>} : vector<16x4xf32>, vector<4x8xf32>, vector<16x8xf32> -> vector<16x8xf32>
    %40 = arith.addf %35, %39 : vector<16x8xf32>
    %c0_27 = arith.constant 0 : index
    %c0_28 = arith.constant 0 : index
    %41 = vector.load %arg8[%c0_27, %c0_28] : memref<1x8xf32, #tpu.memory_space<vmem>>, vector<1x8xf32>
    %42 = vector.broadcast %41 : vector<1x8xf32> to vector<16x8xf32>
    %43 = arith.addf %40, %42 : vector<16x8xf32>
    %cst_29 = arith.constant dense<0.000000e+00> : vector<8xf32>
    %44 = vector.multi_reduction <add>, %43, %cst_29 [0] : vector<16x8xf32> to vector<8xf32>
    %45 = vector.shape_cast %44 : vector<8xf32> to vector<1x8xf32>
    %cst_30 = arith.constant 1.600000e+01 : f32
    %46 = vector.broadcast %cst_30 : f32 to vector<1x8xf32>
    %47 = arith.divf %45, %46 : vector<1x8xf32>
    %48 = vector.broadcast %47 : vector<1x8xf32> to vector<16x8xf32>
    %49 = arith.subf %43, %48 : vector<16x8xf32>
    %50 = arith.mulf %49, %49 : vector<16x8xf32>
    %cst_31 = arith.constant dense<0.000000e+00> : vector<8xf32>
    %51 = vector.multi_reduction <add>, %50, %cst_31 [0] : vector<16x8xf32> to vector<8xf32>
    %52 = vector.shape_cast %51 : vector<8xf32> to vector<1x8xf32>
    %cst_32 = arith.constant 1.600000e+01 : f32
    %53 = vector.broadcast %cst_32 : f32 to vector<1x8xf32>
    %54 = arith.divf %52, %53 : vector<1x8xf32>
    %55 = vector.broadcast %47 : vector<1x8xf32> to vector<16x8xf32>
    %56 = arith.subf %43, %55 : vector<16x8xf32>
    %cst_33 = arith.constant 9.99999974E-6 : f32
    %57 = vector.broadcast %cst_33 : f32 to vector<1x8xf32>
    %58 = arith.addf %54, %57 : vector<1x8xf32>
    %59 = math.rsqrt %58 : vector<1x8xf32>
    %60 = vector.broadcast %59 : vector<1x8xf32> to vector<16x8xf32>
    %61 = arith.mulf %56, %60 : vector<16x8xf32>
    %cst_34 = arith.constant 0.000000e+00 : f32
    %62 = vector.broadcast %cst_34 : f32 to vector<16x8xf32>
    %63 = arith.maximumf %61, %62 : vector<16x8xf32>
    %c0_35 = arith.constant 0 : index
    %c0_36 = arith.constant 0 : index
    %64 = vector.load %arg3[%c0_35, %c0_36] : memref<24x4xf32, #tpu.memory_space<vmem>>, vector<16x4xf32>
    %c0_37 = arith.constant 0 : index
    %c0_38 = arith.constant 0 : index
    %c0_39 = arith.constant 0 : index
    %65 = vector.load %arg6[%c0_37, %c0_38, %c0_39] : memref<5x4x8xf32, #tpu.memory_space<vmem>>, vector<1x4x8xf32>
    %66 = vector.shape_cast %65 : vector<1x4x8xf32> to vector<4x8xf32>
    %cst_40 = arith.constant dense<0.000000e+00> : vector<16x8xf32>
    %67 = tpu.matmul %64, %66, %cst_40 {dimension_numbers = #tpu.dot_dimension_numbers<[1], [0], [0], [1], [0, 0, 1, 1], [], []>} : vector<16x4xf32>, vector<4x8xf32>, vector<16x8xf32> -> vector<16x8xf32>
    %c2_41 = arith.constant 2 : index
    %c0_42 = arith.constant 0 : index
    %68 = vector.load %arg3[%c2_41, %c0_42] : memref<24x4xf32, #tpu.memory_space<vmem>>, vector<16x4xf32>
    %c1_43 = arith.constant 1 : index
    %c0_44 = arith.constant 0 : index
    %c0_45 = arith.constant 0 : index
    %69 = vector.load %arg6[%c1_43, %c0_44, %c0_45] : memref<5x4x8xf32, #tpu.memory_space<vmem>>, vector<1x4x8xf32>
    %70 = vector.shape_cast %69 : vector<1x4x8xf32> to vector<4x8xf32>
    %cst_46 = arith.constant dense<0.000000e+00> : vector<16x8xf32>
    %71 = tpu.matmul %68, %70, %cst_46 {dimension_numbers = #tpu.dot_dimension_numbers<[1], [0], [0], [1], [0, 0, 1, 1], [], []>} : vector<16x4xf32>, vector<4x8xf32>, vector<16x8xf32> -> vector<16x8xf32>
    %72 = arith.addf %67, %71 : vector<16x8xf32>
    %c4_47 = arith.constant 4 : index
    %c0_48 = arith.constant 0 : index
    %73 = vector.load %arg3[%c4_47, %c0_48] : memref<24x4xf32, #tpu.memory_space<vmem>>, vector<16x4xf32>
    %c2_49 = arith.constant 2 : index
    %c0_50 = arith.constant 0 : index
    %c0_51 = arith.constant 0 : index
    %74 = vector.load %arg6[%c2_49, %c0_50, %c0_51] : memref<5x4x8xf32, #tpu.memory_space<vmem>>, vector<1x4x8xf32>
    %75 = vector.shape_cast %74 : vector<1x4x8xf32> to vector<4x8xf32>
    %cst_52 = arith.constant dense<0.000000e+00> : vector<16x8xf32>
    %76 = tpu.matmul %73, %75, %cst_52 {dimension_numbers = #tpu.dot_dimension_numbers<[1], [0], [0], [1], [0, 0, 1, 1], [], []>} : vector<16x4xf32>, vector<4x8xf32>, vector<16x8xf32> -> vector<16x8xf32>
    %77 = arith.addf %72, %76 : vector<16x8xf32>
    %c6 = arith.constant 6 : index
    %c0_53 = arith.constant 0 : index
    %78 = vector.load %arg3[%c6, %c0_53] : memref<24x4xf32, #tpu.memory_space<vmem>>, vector<16x4xf32>
    %c3 = arith.constant 3 : index
    %c0_54 = arith.constant 0 : index
    %c0_55 = arith.constant 0 : index
    %79 = vector.load %arg6[%c3, %c0_54, %c0_55] : memref<5x4x8xf32, #tpu.memory_space<vmem>>, vector<1x4x8xf32>
    %80 = vector.shape_cast %79 : vector<1x4x8xf32> to vector<4x8xf32>
    %cst_56 = arith.constant dense<0.000000e+00> : vector<16x8xf32>
    %81 = tpu.matmul %78, %80, %cst_56 {dimension_numbers = #tpu.dot_dimension_numbers<[1], [0], [0], [1], [0, 0, 1, 1], [], []>} : vector<16x4xf32>, vector<4x8xf32>, vector<16x8xf32> -> vector<16x8xf32>
    %82 = arith.addf %77, %81 : vector<16x8xf32>
    %c8 = arith.constant 8 : index
    %c0_57 = arith.constant 0 : index
    %83 = vector.load %arg3[%c8, %c0_57] : memref<24x4xf32, #tpu.memory_space<vmem>>, vector<16x4xf32>
    %c4_58 = arith.constant 4 : index
    %c0_59 = arith.constant 0 : index
    %c0_60 = arith.constant 0 : index
    %84 = vector.load %arg6[%c4_58, %c0_59, %c0_60] : memref<5x4x8xf32, #tpu.memory_space<vmem>>, vector<1x4x8xf32>
    %85 = vector.shape_cast %84 : vector<1x4x8xf32> to vector<4x8xf32>
    %cst_61 = arith.constant dense<0.000000e+00> : vector<16x8xf32>
    %86 = tpu.matmul %83, %85, %cst_61 {dimension_numbers = #tpu.dot_dimension_numbers<[1], [0], [0], [1], [0, 0, 1, 1], [], []>} : vector<16x4xf32>, vector<4x8xf32>, vector<16x8xf32> -> vector<16x8xf32>
    %87 = arith.addf %82, %86 : vector<16x8xf32>
    %c0_62 = arith.constant 0 : index
    %c0_63 = arith.constant 0 : index
    %88 = vector.load %arg9[%c0_62, %c0_63] : memref<1x8xf32, #tpu.memory_space<vmem>>, vector<1x8xf32>
    %89 = vector.broadcast %88 : vector<1x8xf32> to vector<16x8xf32>
    %90 = arith.addf %87, %89 : vector<16x8xf32>
    %cst_64 = arith.constant dense<0.000000e+00> : vector<8xf32>
    %91 = vector.multi_reduction <add>, %90, %cst_64 [0] : vector<16x8xf32> to vector<8xf32>
    %92 = vector.shape_cast %91 : vector<8xf32> to vector<1x8xf32>
    %cst_65 = arith.constant 1.600000e+01 : f32
    %93 = vector.broadcast %cst_65 : f32 to vector<1x8xf32>
    %94 = arith.divf %92, %93 : vector<1x8xf32>
    %95 = vector.broadcast %94 : vector<1x8xf32> to vector<16x8xf32>
    %96 = arith.subf %90, %95 : vector<16x8xf32>
    %97 = arith.mulf %96, %96 : vector<16x8xf32>
    %cst_66 = arith.constant dense<0.000000e+00> : vector<8xf32>
    %98 = vector.multi_reduction <add>, %97, %cst_66 [0] : vector<16x8xf32> to vector<8xf32>
    %99 = vector.shape_cast %98 : vector<8xf32> to vector<1x8xf32>
    %cst_67 = arith.constant 1.600000e+01 : f32
    %100 = vector.broadcast %cst_67 : f32 to vector<1x8xf32>
    %101 = arith.divf %99, %100 : vector<1x8xf32>
    %102 = vector.broadcast %94 : vector<1x8xf32> to vector<16x8xf32>
    %103 = arith.subf %90, %102 : vector<16x8xf32>
    %cst_68 = arith.constant 9.99999974E-6 : f32
    %104 = vector.broadcast %cst_68 : f32 to vector<1x8xf32>
    %105 = arith.addf %101, %104 : vector<1x8xf32>
    %106 = math.rsqrt %105 : vector<1x8xf32>
    %107 = vector.broadcast %106 : vector<1x8xf32> to vector<16x8xf32>
    %108 = arith.mulf %103, %107 : vector<16x8xf32>
    %cst_69 = arith.constant 0.000000e+00 : f32
    %109 = vector.broadcast %cst_69 : f32 to vector<16x8xf32>
    %110 = arith.maximumf %108, %109 : vector<16x8xf32>
    %c0_70 = arith.constant 0 : index
    %c0_71 = arith.constant 0 : index
    %c0_72 = arith.constant 0 : index
    %111 = vector.load %arg10[%c0_70, %c0_71, %c0_72] : memref<3x8x8xf32, #tpu.memory_space<vmem>>, vector<1x8x8xf32>
    %112 = vector.shape_cast %111 : vector<1x8x8xf32> to vector<8x8xf32>
    %cst_73 = arith.constant dense<0.000000e+00> : vector<16x8xf32>
    %113 = tpu.matmul %26, %112, %cst_73 {dimension_numbers = #tpu.dot_dimension_numbers<[1], [0], [0], [1], [0, 0, 1, 1], [], []>} : vector<16x8xf32>, vector<8x8xf32>, vector<16x8xf32> -> vector<16x8xf32>
    %c1_74 = arith.constant 1 : index
    %c0_75 = arith.constant 0 : index
    %c0_76 = arith.constant 0 : index
    %114 = vector.load %arg10[%c1_74, %c0_75, %c0_76] : memref<3x8x8xf32, #tpu.memory_space<vmem>>, vector<1x8x8xf32>
    %115 = vector.shape_cast %114 : vector<1x8x8xf32> to vector<8x8xf32>
    %cst_77 = arith.constant dense<0.000000e+00> : vector<16x8xf32>
    %116 = tpu.matmul %63, %115, %cst_77 {dimension_numbers = #tpu.dot_dimension_numbers<[1], [0], [0], [1], [0, 0, 1, 1], [], []>} : vector<16x8xf32>, vector<8x8xf32>, vector<16x8xf32> -> vector<16x8xf32>
    %117 = arith.addf %113, %116 : vector<16x8xf32>
    %c2_78 = arith.constant 2 : index
    %c0_79 = arith.constant 0 : index
    %c0_80 = arith.constant 0 : index
    %118 = vector.load %arg10[%c2_78, %c0_79, %c0_80] : memref<3x8x8xf32, #tpu.memory_space<vmem>>, vector<1x8x8xf32>
    %119 = vector.shape_cast %118 : vector<1x8x8xf32> to vector<8x8xf32>
    %cst_81 = arith.constant dense<0.000000e+00> : vector<16x8xf32>
    %120 = tpu.matmul %110, %119, %cst_81 {dimension_numbers = #tpu.dot_dimension_numbers<[1], [0], [0], [1], [0, 0, 1, 1], [], []>} : vector<16x8xf32>, vector<8x8xf32>, vector<16x8xf32> -> vector<16x8xf32>
    %121 = arith.addf %117, %120 : vector<16x8xf32>
    %c0_82 = arith.constant 0 : index
    %c0_83 = arith.constant 0 : index
    %122 = vector.load %arg11[%c0_82, %c0_83] : memref<1x8xf32, #tpu.memory_space<vmem>>, vector<1x8xf32>
    %123 = vector.broadcast %122 : vector<1x8xf32> to vector<16x8xf32>
    %124 = arith.addf %121, %123 : vector<16x8xf32>
    %c0_84 = arith.constant 0 : index
    %c0_85 = arith.constant 0 : index
    %125 = vector.load %arg12[%c0_84, %c0_85] : memref<16x8xf32, #tpu.memory_space<vmem>>, vector<16x8xf32>
    tpu.vector_store %arg12[%c0_84, %c0_85], %124 {strides = array<i32>} : memref<16x8xf32, #tpu.memory_space<vmem>>, vector<16x8xf32>,
    return
  }
  func.func @transform_0(%arg0: i32) -> (i32, i32) {
    %c0_i32 = arith.constant 0 : i32
    %c0_i32_0 = arith.constant 0 : i32
    %c0_i32_1 = arith.constant 0 : i32
    return %c0_i32, %c0_i32_0 : i32, i32
  }
  func.func @transform_1(%arg0: i32) -> (i32, i32) {
    %c0_i32 = arith.constant 0 : i32
    %c0_i32_0 = arith.constant 0 : i32
    %c0_i32_1 = arith.constant 0 : i32
    return %c0_i32, %c0_i32_0 : i32, i32
  }
  func.func @transform_2(%arg0: i32) -> (i32, i32) {
    %c0_i32 = arith.constant 0 : i32
    %c0_i32_0 = arith.constant 0 : i32
    %c0_i32_1 = arith.constant 0 : i32
    return %c0_i32, %c0_i32_0 : i32, i32
  }
  func.func @transform_3(%arg0: i32) -> (i32, i32, i32) {
    %c0_i32 = arith.constant 0 : i32
    %c0_i32_0 = arith.constant 0 : i32
    %c0_i32_1 = arith.constant 0 : i32
    %c0_i32_2 = arith.constant 0 : i32
    return %c0_i32, %c0_i32_0, %c0_i32_1 : i32, i32, i32
  }
  func.func @transform_4(%arg0: i32) -> (i32, i32, i32) {
    %c0_i32 = arith.constant 0 : i32
    %c0_i32_0 = arith.constant 0 : i32
    %c0_i32_1 = arith.constant 0 : i32
    %c0_i32_2 = arith.constant 0 : i32
    return %c0_i32, %c0_i32_0, %c0_i32_1 : i32, i32, i32
  }
  func.func @transform_5(%arg0: i32) -> (i32, i32, i32) {
    %c0_i32 = arith.constant 0 : i32
    %c0_i32_0 = arith.constant 0 : i32
    %c0_i32_1 = arith.constant 0 : i32
    %c0_i32_2 = arith.constant 0 : i32
    return %c0_i32, %c0_i32_0, %c0_i32_1 : i32, i32, i32
  }
  func.func @transform_6(%arg0: i32) -> (i32, i32) {
    %c0_i32 = arith.constant 0 : i32
    %c0_i32_0 = arith.constant 0 : i32
    %c0_i32_1 = arith.constant 0 : i32
    return %c0_i32, %c0_i32_0 : i32, i32
  }
  func.func @transform_7(%arg0: i32) -> (i32, i32) {
    %c0_i32 = arith.constant 0 : i32
    %c0_i32_0 = arith.constant 0 : i32
    %c0_i32_1 = arith.constant 0 : i32
    return %c0_i32, %c0_i32_0 : i32, i32
  }
  func.func @transform_8(%arg0: i32) -> (i32, i32) {
    %c0_i32 = arith.constant 0 : i32
    %c0_i32_0 = arith.constant 0 : i32
    %c0_i32_1 = arith.constant 0 : i32
    return %c0_i32, %c0_i32_0 : i32, i32
  }
  func.func @transform_9(%arg0: i32) -> (i32, i32, i32) {
    %c0_i32 = arith.constant 0 : i32
    %c0_i32_0 = arith.constant 0 : i32
    %c0_i32_1 = arith.constant 0 : i32
    %c0_i32_2 = arith.constant 0 : i32
    return %c0_i32, %c0_i32_0, %c0_i32_1 : i32, i32, i32
  }
  func.func @transform_10(%arg0: i32) -> (i32, i32) {
    %c0_i32 = arith.constant 0 : i32
    %c0_i32_0 = arith.constant 0 : i32
    %c0_i32_1 = arith.constant 0 : i32
    return %c0_i32, %c0_i32_0 : i32, i32
  }
  func.func @transform_11(%arg0: i32) -> (i32, i32) {
    %c0_i32 = arith.constant 0 : i32
    %c0_i32_0 = arith.constant 0 : i32
    %c0_i32_1 = arith.constant 0 : i32
    return %c0_i32, %c0_i32_0 : i32, i32
  }
}

module attributes {stable_mosaic.version = 11 : i64} {
  func.func @_inception_block_kernel(%arg0: i32, %arg1: memref<8x8xf32, #tpu.memory_space<vmem>>, %arg2: memref<12x8xf32, #tpu.memory_space<vmem>>, %arg3: memref<16x8xf32, #tpu.memory_space<vmem>>, %arg4: memref<1x8x16xf32, #tpu.memory_space<vmem>>, %arg5: memref<3x8x16xf32, #tpu.memory_space<vmem>>, %arg6: memref<5x8x16xf32, #tpu.memory_space<vmem>>, %arg7: memref<1x16xf32, #tpu.memory_space<vmem>>, %arg8: memref<1x16xf32, #tpu.memory_space<vmem>>, %arg9: memref<1x16xf32, #tpu.memory_space<vmem>>, %arg10: memref<3x16x16xf32, #tpu.memory_space<vmem>>, %arg11: memref<1x16xf32, #tpu.memory_space<vmem>>, %arg12: memref<4x16x32xf32, #tpu.memory_space<vmem>>, %arg13: memref<1x32xf32, #tpu.memory_space<vmem>>, %arg14: memref<2x32xf32, #tpu.memory_space<vmem>>) attributes {dimension_semantics = [#tpu.dimension_semantics<arbitrary>], iteration_bounds = array<i64: 1>, scalar_prefetch = 0 : i64, scratch_operands = 0 : i64, tpu.core_type = #tpu.core_type<tc>, window_params = [{pipeline_mode = #tpu.pipeline_mode<synchronous>, transform_indices = @transform_0, window_bounds = array<i64: 8, 8>}, {pipeline_mode = #tpu.pipeline_mode<synchronous>, transform_indices = @transform_1, window_bounds = array<i64: 12, 8>}, {pipeline_mode = #tpu.pipeline_mode<synchronous>, transform_indices = @transform_2, window_bounds = array<i64: 16, 8>}, {pipeline_mode = #tpu.pipeline_mode<synchronous>, transform_indices = @transform_3, window_bounds = array<i64: 1, 8, 16>}, {pipeline_mode = #tpu.pipeline_mode<synchronous>, transform_indices = @transform_4, window_bounds = array<i64: 3, 8, 16>}, {pipeline_mode = #tpu.pipeline_mode<synchronous>, transform_indices = @transform_5, window_bounds = array<i64: 5, 8, 16>}, {pipeline_mode = #tpu.pipeline_mode<synchronous>, transform_indices = @transform_6, window_bounds = array<i64: 1, 16>}, {pipeline_mode = #tpu.pipeline_mode<synchronous>, transform_indices = @transform_7, window_bounds = array<i64: 1, 16>}, {pipeline_mode = #tpu.pipeline_mode<synchronous>, transform_indices = @transform_8, window_bounds = array<i64: 1, 16>}, {pipeline_mode = #tpu.pipeline_mode<synchronous>, transform_indices = @transform_9, window_bounds = array<i64: 3, 16, 16>}, {pipeline_mode = #tpu.pipeline_mode<synchronous>, transform_indices = @transform_10, window_bounds = array<i64: 1, 16>}, {pipeline_mode = #tpu.pipeline_mode<synchronous>, transform_indices = @transform_11, window_bounds = array<i64: 4, 16, 32>}, {pipeline_mode = #tpu.pipeline_mode<synchronous>, transform_indices = @transform_12, window_bounds = array<i64: 1, 32>}, {pipeline_mode = #tpu.pipeline_mode<synchronous>, transform_indices = @transform_13, window_bounds = array<i64: 2, 32>}]} {
    %c0 = arith.constant 0 : index
    %c0_0 = arith.constant 0 : index
    %0 = vector.load %arg1[%c0, %c0_0] : memref<8x8xf32, #tpu.memory_space<vmem>>, vector<8x8xf32>
    %c0_1 = arith.constant 0 : index
    %c0_2 = arith.constant 0 : index
    %c0_3 = arith.constant 0 : index
    %1 = vector.load %arg4[%c0_1, %c0_2, %c0_3] : memref<1x8x16xf32, #tpu.memory_space<vmem>>, vector<1x8x16xf32>
    %2 = vector.shape_cast %1 : vector<1x8x16xf32> to vector<8x16xf32>
    %cst = arith.constant dense<0.000000e+00> : vector<8x16xf32>
    %3 = tpu.matmul %0, %2, %cst {dimension_numbers = #tpu.dot_dimension_numbers<[1], [0], [0], [1], [0, 0, 1, 1], [], []>} : vector<8x8xf32>, vector<8x16xf32>, vector<8x16xf32> -> vector<8x16xf32>
    %c0_4 = arith.constant 0 : index
    %c0_5 = arith.constant 0 : index
    %4 = vector.load %arg7[%c0_4, %c0_5] : memref<1x16xf32, #tpu.memory_space<vmem>>, vector<1x16xf32>
    %5 = vector.broadcast %4 : vector<1x16xf32> to vector<8x16xf32>
    %6 = arith.addf %3, %5 : vector<8x16xf32>
    %cst_6 = arith.constant dense<0.000000e+00> : vector<16xf32>
    %7 = vector.multi_reduction <add>, %6, %cst_6 [0] : vector<8x16xf32> to vector<16xf32>
    %8 = vector.shape_cast %7 : vector<16xf32> to vector<1x16xf32>
    %cst_7 = arith.constant 8.000000e+00 : f32
    %9 = vector.broadcast %cst_7 : f32 to vector<1x16xf32>
    %10 = arith.divf %8, %9 : vector<1x16xf32>
    %11 = vector.broadcast %10 : vector<1x16xf32> to vector<8x16xf32>
    %12 = arith.subf %6, %11 : vector<8x16xf32>
    %13 = arith.mulf %12, %12 : vector<8x16xf32>
    %cst_8 = arith.constant dense<0.000000e+00> : vector<16xf32>
    %14 = vector.multi_reduction <add>, %13, %cst_8 [0] : vector<8x16xf32> to vector<16xf32>
    %15 = vector.shape_cast %14 : vector<16xf32> to vector<1x16xf32>
    %cst_9 = arith.constant 8.000000e+00 : f32
    %16 = vector.broadcast %cst_9 : f32 to vector<1x16xf32>
    %17 = arith.divf %15, %16 : vector<1x16xf32>
    %18 = vector.broadcast %10 : vector<1x16xf32> to vector<8x16xf32>
    %19 = arith.subf %6, %18 : vector<8x16xf32>
    %cst_10 = arith.constant 9.99999974E-6 : f32
    %20 = vector.broadcast %cst_10 : f32 to vector<1x16xf32>
    %21 = arith.addf %17, %20 : vector<1x16xf32>
    %22 = math.rsqrt %21 : vector<1x16xf32>
    %23 = vector.broadcast %22 : vector<1x16xf32> to vector<8x16xf32>
    %24 = arith.mulf %19, %23 : vector<8x16xf32>
    %cst_11 = arith.constant 0.000000e+00 : f32
    %25 = vector.broadcast %cst_11 : f32 to vector<8x16xf32>
    %26 = arith.maximumf %24, %25 : vector<8x16xf32>
    %c0_12 = arith.constant 0 : index
    %c0_13 = arith.constant 0 : index
    %27 = vector.load %arg2[%c0_12, %c0_13] : memref<12x8xf32, #tpu.memory_space<vmem>>, vector<8x8xf32>
    %c0_14 = arith.constant 0 : index
    %c0_15 = arith.constant 0 : index
    %c0_16 = arith.constant 0 : index
    %28 = vector.load %arg5[%c0_14, %c0_15, %c0_16] : memref<3x8x16xf32, #tpu.memory_space<vmem>>, vector<1x8x16xf32>
    %29 = vector.shape_cast %28 : vector<1x8x16xf32> to vector<8x16xf32>
    %cst_17 = arith.constant dense<0.000000e+00> : vector<8x16xf32>
    %30 = tpu.matmul %27, %29, %cst_17 {dimension_numbers = #tpu.dot_dimension_numbers<[1], [0], [0], [1], [0, 0, 1, 1], [], []>} : vector<8x8xf32>, vector<8x16xf32>, vector<8x16xf32> -> vector<8x16xf32>
    %c2 = arith.constant 2 : index
    %c0_18 = arith.constant 0 : index
    %31 = vector.load %arg2[%c2, %c0_18] : memref<12x8xf32, #tpu.memory_space<vmem>>, vector<8x8xf32>
    %c1 = arith.constant 1 : index
    %c0_19 = arith.constant 0 : index
    %c0_20 = arith.constant 0 : index
    %32 = vector.load %arg5[%c1, %c0_19, %c0_20] : memref<3x8x16xf32, #tpu.memory_space<vmem>>, vector<1x8x16xf32>
    %33 = vector.shape_cast %32 : vector<1x8x16xf32> to vector<8x16xf32>
    %cst_21 = arith.constant dense<0.000000e+00> : vector<8x16xf32>
    %34 = tpu.matmul %31, %33, %cst_21 {dimension_numbers = #tpu.dot_dimension_numbers<[1], [0], [0], [1], [0, 0, 1, 1], [], []>} : vector<8x8xf32>, vector<8x16xf32>, vector<8x16xf32> -> vector<8x16xf32>
    %35 = arith.addf %30, %34 : vector<8x16xf32>
    %c4 = arith.constant 4 : index
    %c0_22 = arith.constant 0 : index
    %36 = vector.load %arg2[%c4, %c0_22] : memref<12x8xf32, #tpu.memory_space<vmem>>, vector<8x8xf32>
    %c2_23 = arith.constant 2 : index
    %c0_24 = arith.constant 0 : index
    %c0_25 = arith.constant 0 : index
    %37 = vector.load %arg5[%c2_23, %c0_24, %c0_25] : memref<3x8x16xf32, #tpu.memory_space<vmem>>, vector<1x8x16xf32>
    %38 = vector.shape_cast %37 : vector<1x8x16xf32> to vector<8x16xf32>
    %cst_26 = arith.constant dense<0.000000e+00> : vector<8x16xf32>
    %39 = tpu.matmul %36, %38, %cst_26 {dimension_numbers = #tpu.dot_dimension_numbers<[1], [0], [0], [1], [0, 0, 1, 1], [], []>} : vector<8x8xf32>, vector<8x16xf32>, vector<8x16xf32> -> vector<8x16xf32>
    %40 = arith.addf %35, %39 : vector<8x16xf32>
    %c0_27 = arith.constant 0 : index
    %c0_28 = arith.constant 0 : index
    %41 = vector.load %arg8[%c0_27, %c0_28] : memref<1x16xf32, #tpu.memory_space<vmem>>, vector<1x16xf32>
    %42 = vector.broadcast %41 : vector<1x16xf32> to vector<8x16xf32>
    %43 = arith.addf %40, %42 : vector<8x16xf32>
    %cst_29 = arith.constant dense<0.000000e+00> : vector<16xf32>
    %44 = vector.multi_reduction <add>, %43, %cst_29 [0] : vector<8x16xf32> to vector<16xf32>
    %45 = vector.shape_cast %44 : vector<16xf32> to vector<1x16xf32>
    %cst_30 = arith.constant 8.000000e+00 : f32
    %46 = vector.broadcast %cst_30 : f32 to vector<1x16xf32>
    %47 = arith.divf %45, %46 : vector<1x16xf32>
    %48 = vector.broadcast %47 : vector<1x16xf32> to vector<8x16xf32>
    %49 = arith.subf %43, %48 : vector<8x16xf32>
    %50 = arith.mulf %49, %49 : vector<8x16xf32>
    %cst_31 = arith.constant dense<0.000000e+00> : vector<16xf32>
    %51 = vector.multi_reduction <add>, %50, %cst_31 [0] : vector<8x16xf32> to vector<16xf32>
    %52 = vector.shape_cast %51 : vector<16xf32> to vector<1x16xf32>
    %cst_32 = arith.constant 8.000000e+00 : f32
    %53 = vector.broadcast %cst_32 : f32 to vector<1x16xf32>
    %54 = arith.divf %52, %53 : vector<1x16xf32>
    %55 = vector.broadcast %47 : vector<1x16xf32> to vector<8x16xf32>
    %56 = arith.subf %43, %55 : vector<8x16xf32>
    %cst_33 = arith.constant 9.99999974E-6 : f32
    %57 = vector.broadcast %cst_33 : f32 to vector<1x16xf32>
    %58 = arith.addf %54, %57 : vector<1x16xf32>
    %59 = math.rsqrt %58 : vector<1x16xf32>
    %60 = vector.broadcast %59 : vector<1x16xf32> to vector<8x16xf32>
    %61 = arith.mulf %56, %60 : vector<8x16xf32>
    %cst_34 = arith.constant 0.000000e+00 : f32
    %62 = vector.broadcast %cst_34 : f32 to vector<8x16xf32>
    %63 = arith.maximumf %61, %62 : vector<8x16xf32>
    %c0_35 = arith.constant 0 : index
    %c0_36 = arith.constant 0 : index
    %64 = vector.load %arg3[%c0_35, %c0_36] : memref<16x8xf32, #tpu.memory_space<vmem>>, vector<8x8xf32>
    %c0_37 = arith.constant 0 : index
    %c0_38 = arith.constant 0 : index
    %c0_39 = arith.constant 0 : index
    %65 = vector.load %arg6[%c0_37, %c0_38, %c0_39] : memref<5x8x16xf32, #tpu.memory_space<vmem>>, vector<1x8x16xf32>
    %66 = vector.shape_cast %65 : vector<1x8x16xf32> to vector<8x16xf32>
    %cst_40 = arith.constant dense<0.000000e+00> : vector<8x16xf32>
    %67 = tpu.matmul %64, %66, %cst_40 {dimension_numbers = #tpu.dot_dimension_numbers<[1], [0], [0], [1], [0, 0, 1, 1], [], []>} : vector<8x8xf32>, vector<8x16xf32>, vector<8x16xf32> -> vector<8x16xf32>
    %c2_41 = arith.constant 2 : index
    %c0_42 = arith.constant 0 : index
    %68 = vector.load %arg3[%c2_41, %c0_42] : memref<16x8xf32, #tpu.memory_space<vmem>>, vector<8x8xf32>
    %c1_43 = arith.constant 1 : index
    %c0_44 = arith.constant 0 : index
    %c0_45 = arith.constant 0 : index
    %69 = vector.load %arg6[%c1_43, %c0_44, %c0_45] : memref<5x8x16xf32, #tpu.memory_space<vmem>>, vector<1x8x16xf32>
    %70 = vector.shape_cast %69 : vector<1x8x16xf32> to vector<8x16xf32>
    %cst_46 = arith.constant dense<0.000000e+00> : vector<8x16xf32>
    %71 = tpu.matmul %68, %70, %cst_46 {dimension_numbers = #tpu.dot_dimension_numbers<[1], [0], [0], [1], [0, 0, 1, 1], [], []>} : vector<8x8xf32>, vector<8x16xf32>, vector<8x16xf32> -> vector<8x16xf32>
    %72 = arith.addf %67, %71 : vector<8x16xf32>
    %c4_47 = arith.constant 4 : index
    %c0_48 = arith.constant 0 : index
    %73 = vector.load %arg3[%c4_47, %c0_48] : memref<16x8xf32, #tpu.memory_space<vmem>>, vector<8x8xf32>
    %c2_49 = arith.constant 2 : index
    %c0_50 = arith.constant 0 : index
    %c0_51 = arith.constant 0 : index
    %74 = vector.load %arg6[%c2_49, %c0_50, %c0_51] : memref<5x8x16xf32, #tpu.memory_space<vmem>>, vector<1x8x16xf32>
    %75 = vector.shape_cast %74 : vector<1x8x16xf32> to vector<8x16xf32>
    %cst_52 = arith.constant dense<0.000000e+00> : vector<8x16xf32>
    %76 = tpu.matmul %73, %75, %cst_52 {dimension_numbers = #tpu.dot_dimension_numbers<[1], [0], [0], [1], [0, 0, 1, 1], [], []>} : vector<8x8xf32>, vector<8x16xf32>, vector<8x16xf32> -> vector<8x16xf32>
    %77 = arith.addf %72, %76 : vector<8x16xf32>
    %c6 = arith.constant 6 : index
    %c0_53 = arith.constant 0 : index
    %78 = vector.load %arg3[%c6, %c0_53] : memref<16x8xf32, #tpu.memory_space<vmem>>, vector<8x8xf32>
    %c3 = arith.constant 3 : index
    %c0_54 = arith.constant 0 : index
    %c0_55 = arith.constant 0 : index
    %79 = vector.load %arg6[%c3, %c0_54, %c0_55] : memref<5x8x16xf32, #tpu.memory_space<vmem>>, vector<1x8x16xf32>
    %80 = vector.shape_cast %79 : vector<1x8x16xf32> to vector<8x16xf32>
    %cst_56 = arith.constant dense<0.000000e+00> : vector<8x16xf32>
    %81 = tpu.matmul %78, %80, %cst_56 {dimension_numbers = #tpu.dot_dimension_numbers<[1], [0], [0], [1], [0, 0, 1, 1], [], []>} : vector<8x8xf32>, vector<8x16xf32>, vector<8x16xf32> -> vector<8x16xf32>
    %82 = arith.addf %77, %81 : vector<8x16xf32>
    %c8 = arith.constant 8 : index
    %c0_57 = arith.constant 0 : index
    %83 = vector.load %arg3[%c8, %c0_57] : memref<16x8xf32, #tpu.memory_space<vmem>>, vector<8x8xf32>
    %c4_58 = arith.constant 4 : index
    %c0_59 = arith.constant 0 : index
    %c0_60 = arith.constant 0 : index
    %84 = vector.load %arg6[%c4_58, %c0_59, %c0_60] : memref<5x8x16xf32, #tpu.memory_space<vmem>>, vector<1x8x16xf32>
    %85 = vector.shape_cast %84 : vector<1x8x16xf32> to vector<8x16xf32>
    %cst_61 = arith.constant dense<0.000000e+00> : vector<8x16xf32>
    %86 = tpu.matmul %83, %85, %cst_61 {dimension_numbers = #tpu.dot_dimension_numbers<[1], [0], [0], [1], [0, 0, 1, 1], [], []>} : vector<8x8xf32>, vector<8x16xf32>, vector<8x16xf32> -> vector<8x16xf32>
    %87 = arith.addf %82, %86 : vector<8x16xf32>
    %c0_62 = arith.constant 0 : index
    %c0_63 = arith.constant 0 : index
    %88 = vector.load %arg9[%c0_62, %c0_63] : memref<1x16xf32, #tpu.memory_space<vmem>>, vector<1x16xf32>
    %89 = vector.broadcast %88 : vector<1x16xf32> to vector<8x16xf32>
    %90 = arith.addf %87, %89 : vector<8x16xf32>
    %cst_64 = arith.constant dense<0.000000e+00> : vector<16xf32>
    %91 = vector.multi_reduction <add>, %90, %cst_64 [0] : vector<8x16xf32> to vector<16xf32>
    %92 = vector.shape_cast %91 : vector<16xf32> to vector<1x16xf32>
    %cst_65 = arith.constant 8.000000e+00 : f32
    %93 = vector.broadcast %cst_65 : f32 to vector<1x16xf32>
    %94 = arith.divf %92, %93 : vector<1x16xf32>
    %95 = vector.broadcast %94 : vector<1x16xf32> to vector<8x16xf32>
    %96 = arith.subf %90, %95 : vector<8x16xf32>
    %97 = arith.mulf %96, %96 : vector<8x16xf32>
    %cst_66 = arith.constant dense<0.000000e+00> : vector<16xf32>
    %98 = vector.multi_reduction <add>, %97, %cst_66 [0] : vector<8x16xf32> to vector<16xf32>
    %99 = vector.shape_cast %98 : vector<16xf32> to vector<1x16xf32>
    %cst_67 = arith.constant 8.000000e+00 : f32
    %100 = vector.broadcast %cst_67 : f32 to vector<1x16xf32>
    %101 = arith.divf %99, %100 : vector<1x16xf32>
    %102 = vector.broadcast %94 : vector<1x16xf32> to vector<8x16xf32>
    %103 = arith.subf %90, %102 : vector<8x16xf32>
    %cst_68 = arith.constant 9.99999974E-6 : f32
    %104 = vector.broadcast %cst_68 : f32 to vector<1x16xf32>
    %105 = arith.addf %101, %104 : vector<1x16xf32>
    %106 = math.rsqrt %105 : vector<1x16xf32>
    %107 = vector.broadcast %106 : vector<1x16xf32> to vector<8x16xf32>
    %108 = arith.mulf %103, %107 : vector<8x16xf32>
    %cst_69 = arith.constant 0.000000e+00 : f32
    %109 = vector.broadcast %cst_69 : f32 to vector<8x16xf32>
    %110 = arith.maximumf %108, %109 : vector<8x16xf32>
    %c0_70 = arith.constant 0 : index
    %c0_71 = arith.constant 0 : index
    %c0_72 = arith.constant 0 : index
    %111 = vector.load %arg10[%c0_70, %c0_71, %c0_72] : memref<3x16x16xf32, #tpu.memory_space<vmem>>, vector<1x16x16xf32>
    %112 = vector.shape_cast %111 : vector<1x16x16xf32> to vector<16x16xf32>
    %cst_73 = arith.constant dense<0.000000e+00> : vector<8x16xf32>
    %113 = tpu.matmul %26, %112, %cst_73 {dimension_numbers = #tpu.dot_dimension_numbers<[1], [0], [0], [1], [0, 0, 1, 1], [], []>} : vector<8x16xf32>, vector<16x16xf32>, vector<8x16xf32> -> vector<8x16xf32>
    %c1_74 = arith.constant 1 : index
    %c0_75 = arith.constant 0 : index
    %c0_76 = arith.constant 0 : index
    %114 = vector.load %arg10[%c1_74, %c0_75, %c0_76] : memref<3x16x16xf32, #tpu.memory_space<vmem>>, vector<1x16x16xf32>
    %115 = vector.shape_cast %114 : vector<1x16x16xf32> to vector<16x16xf32>
    %cst_77 = arith.constant dense<0.000000e+00> : vector<8x16xf32>
    %116 = tpu.matmul %63, %115, %cst_77 {dimension_numbers = #tpu.dot_dimension_numbers<[1], [0], [0], [1], [0, 0, 1, 1], [], []>} : vector<8x16xf32>, vector<16x16xf32>, vector<8x16xf32> -> vector<8x16xf32>
    %117 = arith.addf %113, %116 : vector<8x16xf32>
    %c2_78 = arith.constant 2 : index
    %c0_79 = arith.constant 0 : index
    %c0_80 = arith.constant 0 : index
    %118 = vector.load %arg10[%c2_78, %c0_79, %c0_80] : memref<3x16x16xf32, #tpu.memory_space<vmem>>, vector<1x16x16xf32>
    %119 = vector.shape_cast %118 : vector<1x16x16xf32> to vector<16x16xf32>
    %cst_81 = arith.constant dense<0.000000e+00> : vector<8x16xf32>
    %120 = tpu.matmul %110, %119, %cst_81 {dimension_numbers = #tpu.dot_dimension_numbers<[1], [0], [0], [1], [0, 0, 1, 1], [], []>} : vector<8x16xf32>, vector<16x16xf32>, vector<8x16xf32> -> vector<8x16xf32>
    %121 = arith.addf %117, %120 : vector<8x16xf32>
    %c0_82 = arith.constant 0 : index
    %c0_83 = arith.constant 0 : index
    %122 = vector.load %arg11[%c0_82, %c0_83] : memref<1x16xf32, #tpu.memory_space<vmem>>, vector<1x16xf32>
    %123 = vector.broadcast %122 : vector<1x16xf32> to vector<8x16xf32>
    %124 = arith.addf %121, %123 : vector<8x16xf32>
    %cst_84 = arith.constant 0.000000e+00 : f32
    %125 = vector.broadcast %cst_84 : f32 to vector<2x32xf32>
    %126 = vector.extract_strided_slice %124 {offsets = [0, 0], sizes = [2, 16], strides = [1, 1]} : vector<8x16xf32> to vector<2x16xf32>
    %c0_85 = arith.constant 0 : index
    %c0_86 = arith.constant 0 : index
    %c0_87 = arith.constant 0 : index
    %127 = vector.load %arg12[%c0_85, %c0_86, %c0_87] : memref<4x16x32xf32, #tpu.memory_space<vmem>>, vector<1x16x32xf32>
    %128 = vector.shape_cast %127 : vector<1x16x32xf32> to vector<16x32xf32>
    %cst_88 = arith.constant dense<0.000000e+00> : vector<2x32xf32>
    %129 = tpu.matmul %126, %128, %cst_88 {dimension_numbers = #tpu.dot_dimension_numbers<[1], [0], [0], [1], [0, 0, 1, 1], [], []>} : vector<2x16xf32>, vector<16x32xf32>, vector<2x32xf32> -> vector<2x32xf32>
    %130 = arith.addf %125, %129 : vector<2x32xf32>
    %131 = vector.extract_strided_slice %124 {offsets = [2, 0], sizes = [2, 16], strides = [1, 1]} : vector<8x16xf32> to vector<2x16xf32>
    %c1_89 = arith.constant 1 : index
    %c0_90 = arith.constant 0 : index
    %c0_91 = arith.constant 0 : index
    %132 = vector.load %arg12[%c1_89, %c0_90, %c0_91] : memref<4x16x32xf32, #tpu.memory_space<vmem>>, vector<1x16x32xf32>
    %133 = vector.shape_cast %132 : vector<1x16x32xf32> to vector<16x32xf32>
    %cst_92 = arith.constant dense<0.000000e+00> : vector<2x32xf32>
    %134 = tpu.matmul %131, %133, %cst_92 {dimension_numbers = #tpu.dot_dimension_numbers<[1], [0], [0], [1], [0, 0, 1, 1], [], []>} : vector<2x16xf32>, vector<16x32xf32>, vector<2x32xf32> -> vector<2x32xf32>
    %135 = arith.addf %130, %134 : vector<2x32xf32>
    %136 = vector.extract_strided_slice %124 {offsets = [4, 0], sizes = [2, 16], strides = [1, 1]} : vector<8x16xf32> to vector<2x16xf32>
    %c2_93 = arith.constant 2 : index
    %c0_94 = arith.constant 0 : index
    %c0_95 = arith.constant 0 : index
    %137 = vector.load %arg12[%c2_93, %c0_94, %c0_95] : memref<4x16x32xf32, #tpu.memory_space<vmem>>, vector<1x16x32xf32>
    %138 = vector.shape_cast %137 : vector<1x16x32xf32> to vector<16x32xf32>
    %cst_96 = arith.constant dense<0.000000e+00> : vector<2x32xf32>
    %139 = tpu.matmul %136, %138, %cst_96 {dimension_numbers = #tpu.dot_dimension_numbers<[1], [0], [0], [1], [0, 0, 1, 1], [], []>} : vector<2x16xf32>, vector<16x32xf32>, vector<2x32xf32> -> vector<2x32xf32>
    %140 = arith.addf %135, %139 : vector<2x32xf32>
    %141 = vector.extract_strided_slice %124 {offsets = [6, 0], sizes = [2, 16], strides = [1, 1]} : vector<8x16xf32> to vector<2x16xf32>
    %c3_97 = arith.constant 3 : index
    %c0_98 = arith.constant 0 : index
    %c0_99 = arith.constant 0 : index
    %142 = vector.load %arg12[%c3_97, %c0_98, %c0_99] : memref<4x16x32xf32, #tpu.memory_space<vmem>>, vector<1x16x32xf32>
    %143 = vector.shape_cast %142 : vector<1x16x32xf32> to vector<16x32xf32>
    %cst_100 = arith.constant dense<0.000000e+00> : vector<2x32xf32>
    %144 = tpu.matmul %141, %143, %cst_100 {dimension_numbers = #tpu.dot_dimension_numbers<[1], [0], [0], [1], [0, 0, 1, 1], [], []>} : vector<2x16xf32>, vector<16x32xf32>, vector<2x32xf32> -> vector<2x32xf32>
    %145 = arith.addf %140, %144 : vector<2x32xf32>
    %c0_101 = arith.constant 0 : index
    %c0_102 = arith.constant 0 : index
    %146 = vector.load %arg13[%c0_101, %c0_102] : memref<1x32xf32, #tpu.memory_space<vmem>>, vector<1x32xf32>
    %147 = vector.broadcast %146 : vector<1x32xf32> to vector<2x32xf32>
    %148 = arith.addf %145, %147 : vector<2x32xf32>
    %c0_103 = arith.constant 0 : index
    %c0_104 = arith.constant 0 : index
    %149 = vector.load %arg14[%c0_103, %c0_104] : memref<2x32xf32, #tpu.memory_space<vmem>>, vector<2x32xf32>
    tpu.vector_store %arg14[%c0_103, %c0_104], %148 {strides = array<i32>} : memref<2x32xf32, #tpu.memory_space<vmem>>, vector<2x32xf32>,
    return
  }
  func.func @transform_0(%arg0: i32) -> (i32, i32) {
    %c0_i32 = arith.constant 0 : i32
    %c0_i32_0 = arith.constant 0 : i32
    %c0_i32_1 = arith.constant 0 : i32
    return %c0_i32, %c0_i32_0 : i32, i32
  }
  func.func @transform_1(%arg0: i32) -> (i32, i32) {
    %c0_i32 = arith.constant 0 : i32
    %c0_i32_0 = arith.constant 0 : i32
    %c0_i32_1 = arith.constant 0 : i32
    return %c0_i32, %c0_i32_0 : i32, i32
  }
  func.func @transform_2(%arg0: i32) -> (i32, i32) {
    %c0_i32 = arith.constant 0 : i32
    %c0_i32_0 = arith.constant 0 : i32
    %c0_i32_1 = arith.constant 0 : i32
    return %c0_i32, %c0_i32_0 : i32, i32
  }
  func.func @transform_3(%arg0: i32) -> (i32, i32, i32) {
    %c0_i32 = arith.constant 0 : i32
    %c0_i32_0 = arith.constant 0 : i32
    %c0_i32_1 = arith.constant 0 : i32
    %c0_i32_2 = arith.constant 0 : i32
    return %c0_i32, %c0_i32_0, %c0_i32_1 : i32, i32, i32
  }
  func.func @transform_4(%arg0: i32) -> (i32, i32, i32) {
    %c0_i32 = arith.constant 0 : i32
    %c0_i32_0 = arith.constant 0 : i32
    %c0_i32_1 = arith.constant 0 : i32
    %c0_i32_2 = arith.constant 0 : i32
    return %c0_i32, %c0_i32_0, %c0_i32_1 : i32, i32, i32
  }
  func.func @transform_5(%arg0: i32) -> (i32, i32, i32) {
    %c0_i32 = arith.constant 0 : i32
    %c0_i32_0 = arith.constant 0 : i32
    %c0_i32_1 = arith.constant 0 : i32
    %c0_i32_2 = arith.constant 0 : i32
    return %c0_i32, %c0_i32_0, %c0_i32_1 : i32, i32, i32
  }
  func.func @transform_6(%arg0: i32) -> (i32, i32) {
    %c0_i32 = arith.constant 0 : i32
    %c0_i32_0 = arith.constant 0 : i32
    %c0_i32_1 = arith.constant 0 : i32
    return %c0_i32, %c0_i32_0 : i32, i32
  }
  func.func @transform_7(%arg0: i32) -> (i32, i32) {
    %c0_i32 = arith.constant 0 : i32
    %c0_i32_0 = arith.constant 0 : i32
    %c0_i32_1 = arith.constant 0 : i32
    return %c0_i32, %c0_i32_0 : i32, i32
  }
  func.func @transform_8(%arg0: i32) -> (i32, i32) {
    %c0_i32 = arith.constant 0 : i32
    %c0_i32_0 = arith.constant 0 : i32
    %c0_i32_1 = arith.constant 0 : i32
    return %c0_i32, %c0_i32_0 : i32, i32
  }
  func.func @transform_9(%arg0: i32) -> (i32, i32, i32) {
    %c0_i32 = arith.constant 0 : i32
    %c0_i32_0 = arith.constant 0 : i32
    %c0_i32_1 = arith.constant 0 : i32
    %c0_i32_2 = arith.constant 0 : i32
    return %c0_i32, %c0_i32_0, %c0_i32_1 : i32, i32, i32
  }
  func.func @transform_10(%arg0: i32) -> (i32, i32) {
    %c0_i32 = arith.constant 0 : i32
    %c0_i32_0 = arith.constant 0 : i32
    %c0_i32_1 = arith.constant 0 : i32
    return %c0_i32, %c0_i32_0 : i32, i32
  }
  func.func @transform_11(%arg0: i32) -> (i32, i32, i32) {
    %c0_i32 = arith.constant 0 : i32
    %c0_i32_0 = arith.constant 0 : i32
    %c0_i32_1 = arith.constant 0 : i32
    %c0_i32_2 = arith.constant 0 : i32
    return %c0_i32, %c0_i32_0, %c0_i32_1 : i32, i32, i32
  }
  func.func @transform_12(%arg0: i32) -> (i32, i32) {
    %c0_i32 = arith.constant 0 : i32
    %c0_i32_0 = arith.constant 0 : i32
    %c0_i32_1 = arith.constant 0 : i32
    return %c0_i32, %c0_i32_0 : i32, i32
  }
  func.func @transform_13(%arg0: i32) -> (i32, i32) {
    %c0_i32 = arith.constant 0 : i32
    %c0_i32_0 = arith.constant 0 : i32
    %c0_i32_1 = arith.constant 0 : i32
    return %c0_i32, %c0_i32_0 : i32, i32
  }
}

</mosaic_0001>

<bundles_post_ra>
// kernel: _lambda_.2
= control target key start
LH: loop header
LB: loop body
LE: loop exit
PB: predicated region body
PF: predicated region fallthrough
CT: control target
= control target key end

     0   :  { %vm55_vm0 = vcmask 1043456   ;;  %vm48_vm1 = vcmask 31744   ;;  %vm134_vm2 = vcmask 64512   ;;  %s1607_s3 = inlined_call_operand.vmem [shape: f32[1,4,8], index: 3, kind: input, shape index: {}]   ;;  %s1608_s4 = inlined_call_operand.vmem [shape: f32[3,4,8], index: 4, kind: input, shape index: {}]   ;;  %s1609_s0 = inlined_call_operand.vmem [shape: f32[16,4], index: 0, kind: input, shape index: {}]   ;;  %s1610_s1 = inlined_call_operand.vmem [shape: f32[20,4], index: 1, kind: input, shape index: {}]   ;;  %s1611_s5 = inlined_call_operand.vmem [shape: f32[5,4,8], index: 5, kind: input, shape index: {}]   ;;  %s1612_s2 = inlined_call_operand.vmem [shape: f32[24,4], index: 2, kind: input, shape index: {}]   ;;  %s1613_s9 = inlined_call_operand.vmem [shape: f32[3,8,8], index: 9, kind: input, shape index: {}]   ;;  %s1614_s6 = inlined_call_operand.vmem [shape: f32[1,8], index: 6, kind: input, shape index: {}]   ;;  %s1615_s7 = inlined_call_operand.vmem [shape: f32[1,8], index: 7, kind: input, shape index: {}]   ;;  %s1616_s8 = inlined_call_operand.vmem [shape: f32[1,8], index: 8, kind: input, shape index: {}]   ;;  %s1617_s10 = inlined_call_operand.vmem [shape: f32[1,8], index: 10, kind: input, shape index: {}]   ;;  %s1618_s11 = inlined_call_operand.vmem [shape: f32[16,8], index: 11, kind: output, shape index: {}]  }
   0x1   :  { %v40_v0 = vld [vmem:[%s1607_s3] sm:$0xf]  ;;  %v1223_v1 = vld [vmem:[%s1608_s4 + $0x4] sm:$0xf]  ;;  %v39_v3 = vld [vmem:[%s1609_s0 + $0x8] sm:$0xff] }
   0x2   :  { %v38_v2 = vld [vmem:[%s1609_s0] sm:$0xff]  ;;  %1300 = vmatprep.subr.msk.mxu0 %vm55_vm0, %v40_v0  ;;  %1305 = vmatprep.subr.msk.mxu1 %vm55_vm0, %v1223_v1  ;;  %v170_v5 = vld [vmem:[%s1610_s1 + $0xa] sm:$0xff] }
   0x3   :  { %v169_v4 = vld [vmem:[%s1610_s1 + $0x2] sm:$0xff]  ;;  %1301 = vmatpush3.msk.msra.mxu0 %vm55_vm0, %v40_v0  ;;  %1302 = vmatprep.mubr.msk.f32.mxu0 %vm48_vm1, %v38_v2  ;;  %v474_v10 = vld [vmem:[%s1612_s2 + $0xa] sm:$0xff]  ;;  %v1219_v28 = vld [vmem:[%s1614_s6] ss:$0 sm:$0xff] }
   0x4   :  { %v1235_v6 = vld [vmem:[%s1611_s5 + $0x4] sm:$0xf]  ;;  %1306 = vmatpush3.msk.msra.mxu1 %vm55_vm0, %v1223_v1  ;;  %1307 = vmatprep.mubr.msk.f32.mxu1 %vm48_vm1, %v169_v4  ;;  %v168_v8 = vld [vmem:[%s1608_s4] sm:$0xf]  ;;  %v1230_v13 = vld [vmem:[%s1608_s4 + $0x8] sm:$0xf] }
   0x5   :  { %v473_v7 = vld [vmem:[%s1612_s2 + $0x2] sm:$0xff]  ;;  %1303 = vmatmul.mubr.msk.f32.vlgmr.msra.gmra.mrb[0].mxu0 %vm48_vm1, %v39_v3  ;;  %1308 = vmatmul.mubr.msk.f32.vlgmr.msra.gmra.mrb[0].mxu1 %vm48_vm1, %v170_v5  ;;  %v1246_v19 = vld [vmem:[%s1611_s5 + $0xc] sm:$0xf]  ;;  %v1250_v23 = vld [vmem:[%s1611_s5 + $0x10] sm:$0xf] }
   0x6   :  { %v472_v9 = vld [vmem:[%s1611_s5] sm:$0xf]  ;;  %1320 = vmatprep.subr.msk.mxu0 %vm55_vm0, %v1235_v6  ;;  %1322 = vmatprep.mubr.msk.f32.mxu0 %vm48_vm1, %v473_v7  ;;  %v1242_v14 = vld [vmem:[%s1611_s5 + $0x8] sm:$0xf]  ;;  %v342_v20 = vld [vmem:[%s1610_s1 + $0xc] sm:$0xff] }
   0x7   :  { %v166_v11 = vld [vmem:[%s1610_s1] sm:$0xff]  ;;  %1321 = vmatpush3.msk.msra.mxu0 %vm55_vm0, %v1235_v6  ;;  %1310 = vmatprep.subr.msk.mxu1 %vm55_vm0, %v168_v8  ;;  %v167_v15 = vld [vmem:[%s1610_s1 + $0x8] sm:$0xff]  ;;  %v826_v25 = vld [vmem:[%s1612_s2 + $0x10] sm:$0xff] }
   0x8   :  { %v470_v12 = vld [vmem:[%s1612_s2] sm:$0xff]  ;;  %1325 = vmatprep.subr.msk.mxu0 %vm55_vm0, %v472_v9  ;;  %1311 = vmatpush3.msk.msra.mxu1 %vm55_vm0, %v168_v8  ;;  %v471_v17 = vld [vmem:[%s1612_s2 + $0x8] sm:$0xff] }
   0x9   :  { %1323 = vmatmul.mubr.msk.f32.vlgmr.msra.gmra.mrb[2].mxu0 %vm48_vm1, %v474_v10  ;;  %1312 = vmatprep.mubr.msk.f32.mxu1 %vm48_vm1, %v166_v11  ;;  %v341_v16 = vld [vmem:[%s1610_s1 + $0x4] sm:$0xff]  ;;  %v646_v21 = vld [vmem:[%s1612_s2 + $0xc] sm:$0xff]  ;;  %v1234_v40 = vld [vmem:[%s1615_s7] ss:$0 sm:$0xff] }
   0xa   :  { %1326 = vmatpush3.msk.msra.mxu0 %vm55_vm0, %v472_v9  ;;  %1327 = vmatprep.mubr.msk.f32.mxu0 %vm48_vm1, %v470_v12  ;;  %v645_v18 = vld [vmem:[%s1612_s2 + $0x4] sm:$0xff]  ;;  %v736_v24 = vld [vmem:[%s1612_s2 + $0xe] sm:$0xff]  ;;  %v1254_v4 = vld [vmem:[%s1616_s8] ss:$0 sm:$0xff] }
   0xb   :  { %1315 = vmatprep.subr.msk.mxu1 %vm55_vm0, %v1230_v13  ;;  %1330 = vmatprep.subr.msk.mxu0 %vm55_vm0, %v1242_v14  ;;  %v735_v22 = vld [vmem:[%s1612_s2 + $0x6] sm:$0xff] }
   0xc   :  { %v1255_v26 = vld [vmem:[%s1613_s9 + $0x8] sm:$0xff]  ;;  %v1562_v27 = vld [vmem:[%s1613_s9] sm:$0xff] }
   0xd   :  { %1313 = vmatmul.mubr.msk.f32.vlgmr.msra.gmra.mrb[0].mxu1 %vm48_vm1, %v167_v15 }
   0xe   :  { %1316 = vmatpush3.msk.msra.mxu1 %vm55_vm0, %v1230_v13  ;;  %1317 = vmatprep.mubr.msk.f32.mxu1 %vm48_vm1, %v341_v16 }
   0xf   :  { %1345 = vmatprep.subr.mxu1 %v1255_v26 }
  0x11   :  { %1328 = vmatmul.mubr.msk.f32.vlgmr.msra.gmra.mrb[2].mxu0 %vm48_vm1, %v471_v17 }
  0x12   :  { %1331 = vmatpush3.msk.msra.mxu0 %vm55_vm0, %v1242_v14  ;;  %1332 = vmatprep.mubr.msk.f32.mxu0 %vm48_vm1, %v645_v18 }
  0x13   :  { %1335 = vmatprep.subr.msk.mxu0 %vm55_vm0, %v1246_v19 }
  0x15   :  { %1318 = vmatmul.mubr.msk.f32.vlgmr.msra.gmra.mrb[0].mxu1 %vm48_vm1, %v342_v20 }
  0x16   :  { %1346 = vmatpush3.msra.mxu1 %v1255_v26 }
  0x17   :  { %1350 = vmatprep.subr.mxu1 %v1562_v27 }
  0x19   :  { %1333 = vmatmul.mubr.msk.f32.vlgmr.msra.gmra.mrb[2].mxu0 %vm48_vm1, %v646_v21 }
  0x1a   :  { %1336 = vmatpush3.msk.msra.mxu0 %vm55_vm0, %v1246_v19  ;;  %1337 = vmatprep.mubr.msk.f32.mxu0 %vm48_vm1, %v735_v22 }
  0x1b   :  { %1340 = vmatprep.subr.msk.mxu0 %vm55_vm0, %v1250_v23 }
  0x21   :  { %1338 = vmatmul.mubr.msk.f32.vlgmr.msra.gmra.mrb[2].mxu0 %vm48_vm1, %v736_v24 }
  0x22   :  { %1341 = vmatpush3.msk.msra.mxu0 %vm55_vm0, %v1250_v23  ;;  %1342 = vmatprep.mubr.msk.f32.mxu0 %vm48_vm1, %v471_v17 }
  0x29   :  { %1343 = vmatmul.mubr.msk.f32.vlgmr.msra.gmra.mrb[2].mxu0 %vm48_vm1, %v826_v25 }
  0xd8   :  { %v1304_v29 = vpop.f32.mrb[0].mxu0 }
  0xd9   :  { %v131_v30 = vadd.f32 %v1304_v29, %v1219_v28  ;;  %v125_v31 = vpop.f32.mrb[1].mxu0 }
  0xda   :  { %v126_v32 = vadd.f32 %v1219_v28, %v125_v31 }
  0xdb   :  { %v136_v33 = vsel %vm134_vm2, %v131_v30, 0.0 }
  0xdc   :  { %v135_v34 = vsel %vm134_vm2, %v126_v32, 0.0 }
  0xdd   :  { %v137_v35 = vadd.f32 %v136_v33, %v135_v34 }
  0xdf   :  { %v138_v36 = vrot.slane %v137_v35, 4 }
  0xe1   :  { %v139_v37 = vadd.f32 %v138_v36, %v137_v35 }
  0xe3   :  { %v140_v38 = vrot.slane %v139_v37, 2 }
  0xe5   :  { %v141_v39 = vadd.f32 %v140_v38, %v139_v37 }
  0xe7   :  { %v142_v41 = vrot.slane %v141_v39, 1 }
  0xe8   :  { %v1319_v42 = vpop.f32.mrb[0].mxu1 }
  0xe9   :  { %v143_v43 = vadd.f32 %v142_v41, %v141_v39  ;;  %v439_v44 = vadd.f32 %v1319_v42, %v1234_v40  ;;  %v420_v45 = vpop.f32.mrb[1].mxu1 }
  0xea   :  { %v438_v46 = vadd.f32 %v1234_v40, %v420_v45 }
  0xeb   :  { %v145_v47 = vmul.f32 0.0625, %v143_v43  ;;  %v441_v48 = vsel %vm134_vm2, %v439_v44, 0.0 }
  0xec   :  { %v440_v49 = vsel %vm134_vm2, %v438_v46, 0.0 }
  0xed   :  { %v146_v50 = vsub.f32 %v126_v32, %v145_v47  ;;  %v147_v51 = vsub.f32 %v131_v30, %v145_v47  ;;  %v442_v52 = vadd.f32 %v441_v48, %v440_v49 }
  0xef   :  { %v148_v53 = vmul.f32 %v146_v50, %v146_v50  ;;  %v149_v54 = vmul.f32 %v147_v51, %v147_v51  ;;  %v443_v55 = vrot.slane %v442_v52, 4 }
  0xf1   :  { %v150_v56 = vsel %vm134_vm2, %v148_v53, 0.0  ;;  %v151_v57 = vsel %vm134_vm2, %v149_v54, 0.0  ;;  %v444_v58 = vadd.f32 %v443_v55, %v442_v52 }
  0xf2   :  { %v152_v59 = vadd.f32 %v151_v57, %v150_v56 }
  0xf3   :  { %v445_v60 = vrot.slane %v444_v58, 2 }
  0xf4   :  { %v153_v61 = vrot.slane %v152_v59, 4 }
  0xf5   :  { %v446_v62 = vadd.f32 %v445_v60, %v444_v58 }
  0xf6   :  { %v154_v63 = vadd.f32 %v153_v61, %v152_v59 }
  0xf7   :  { %v447_v0 = vrot.slane %v446_v62, 1 }
  0xf8   :  { %v155_v1 = vrot.slane %v154_v63, 2 }
  0xf9   :  { %v448_v2 = vadd.f32 %v447_v0, %v446_v62  ;;  %v1260_v62 = vld [vmem:[%s1613_s9 + $0x10] sm:$0xff] }
  0xfa   :  { %v156_v3 = vadd.f32 %v155_v1, %v154_v63 }
  0xfb   :  { %v449_v5 = vmul.f32 0.0625, %v448_v2 }
  0xfc   :  { %v157_v6 = vrot.slane %v156_v3, 1  ;;  %v1344_v7 = vpop.f32.mrb[2].mxu0 }
  0xfd   :  { %v450_v8 = vsub.f32 %v438_v46, %v449_v5  ;;  %v451_v9 = vsub.f32 %v439_v44, %v449_v5  ;;  %v923_v10 = vadd.f32 %v1344_v7, %v1254_v4  ;;  %v904_v11 = vpop.f32.mrb[3].mxu0 }
  0xfe   :  { %v158_v12 = vadd.f32 %v157_v6, %v156_v3  ;;  %v922_v13 = vadd.f32 %v1254_v4, %v904_v11 }
  0xff   :  { %v452_v14 = vmul.f32 %v450_v8, %v450_v8  ;;  %v453_v15 = vmul.f32 %v451_v9, %v451_v9  ;;  %v925_v16 = vsel %vm134_vm2, %v923_v10, 0.0 }
 0x100   :  { %v159_v17 = vmul.f32 0.0625, %v158_v12  ;;  %v924_v18 = vsel %vm134_vm2, %v922_v13, 0.0 }
 0x101   :  { %v454_v19 = vsel %vm134_vm2, %v452_v14, 0.0  ;;  %v455_v20 = vsel %vm134_vm2, %v453_v15, 0.0  ;;  %v926_v21 = vadd.f32 %v925_v16, %v924_v18 }
 0x102   :  { %v160_v22 = vadd.f32 1e-05, %v159_v17  ;;  %v456_v23 = vadd.f32 %v455_v20, %v454_v19 }
 0x103   :  { %v927_v24 = vrot.slane %v926_v21, 4 }
 0x104   :  { %1376 = vrsqrt.f32 %v160_v22  ;;  %v457_v25 = vrot.slane %v456_v23, 4 }
 0x105   :  { %v928_v26 = vadd.f32 %v927_v24, %v926_v21 }
 0x106   :  { %v458_v28 = vadd.f32 %v457_v25, %v456_v23 }
 0x107   :  { %v929_v29 = vrot.slane %v928_v26, 2 }
 0x108   :  { %v459_v30 = vrot.slane %v458_v28, 2 }
 0x109   :  { %v930_v31 = vadd.f32 %v929_v29, %v928_v26 }
 0x10a   :  { %v460_v32 = vadd.f32 %v459_v30, %v458_v28 }
 0x10b   :  { %v931_v33 = vrot.slane %v930_v31, 1 }
 0x10c   :  { %v461_v34 = vrot.slane %v460_v32, 1 }
 0x10d   :  { %v932_v35 = vadd.f32 %v931_v33, %v930_v31 }
 0x10e   :  { %v1377_v36 = vpop.eup %1376  ;;  %v462_v37 = vadd.f32 %v461_v34, %v460_v32 }
 0x10f   :  { %v162_v38 = vmul.f32 %v1377_v36, %v146_v50  ;;  %v163_v39 = vmul.f32 %v1377_v36, %v147_v51  ;;  %v933_v40 = vmul.f32 0.0625, %v932_v35 }
 0x110   :  { %v463_v41 = vmul.f32 0.0625, %v462_v37 }
 0x111   :  { %v934_v42 = vsub.f32 %v922_v13, %v933_v40  ;;  %v935_v43 = vsub.f32 %v923_v10, %v933_v40  ;;  %v164_v61 = vmax.f32 %v162_v38, 0.0  ;;  %v165_v1 = vmax.f32 %v163_v39, 0.0 }
 0x112   :  { %v464_v44 = vadd.f32 1e-05, %v463_v41 }
 0x113   :  { %v936_v45 = vmul.f32 %v934_v42, %v934_v42  ;;  %v937_v46 = vmul.f32 %v935_v43, %v935_v43 }
 0x114   :  { %1378 = vrsqrt.f32 %v464_v44 }
 0x115   :  { %v938_v47 = vsel %vm134_vm2, %v936_v45, 0.0  ;;  %v939_v48 = vsel %vm134_vm2, %v937_v46, 0.0 }
 0x116   :  { %v940_v49 = vadd.f32 %v939_v48, %v938_v47 }
 0x118   :  { %v941_v52 = vrot.slane %v940_v49, 4 }
 0x11a   :  { %v942_v53 = vadd.f32 %v941_v52, %v940_v49 }
 0x11c   :  { %v943_v54 = vrot.slane %v942_v53, 2 }
 0x11e   :  { %v1379_v55 = vpop.eup %1378  ;;  %v944_v56 = vadd.f32 %v943_v54, %v942_v53 }
 0x11f   :  { %v466_v50 = vmul.f32 %v1379_v55, %v450_v8  ;;  %v467_v51 = vmul.f32 %v1379_v55, %v451_v9 }
 0x120   :  { %v945_v57 = vrot.slane %v944_v56, 1 }
 0x121   :  { %v468_v58 = vmax.f32 %v466_v50, 0.0  ;;  %v469_v59 = vmax.f32 %v467_v51, 0.0 }
 0x122   :  { %v946_v60 = vadd.f32 %v945_v57, %v944_v56 }
 0x123   :  { %1347 = vmatprep.mubr.msk.f32.mxu1 %vm134_vm2, %v468_v58 }
 0x124   :  { %v947_v63 = vmul.f32 0.0625, %v946_v60  ;;  %1348 = vmatmul.mubr.msk.f32.vlgmr.msra.gmra.mrb[2].mxu1 %vm134_vm2, %v469_v59 }
 0x125   :  { %1352 = vmatprep.mubr.msk.f32.mxu1 %vm134_vm2, %v164_v61  ;;  %1351 = vmatpush3.msra.mxu1 %v1562_v27  ;;  %v1263_v27 = vld [vmem:[%s1617_s10] ss:$0 sm:$0xff] }
 0x126   :  { %v948_v0 = vadd.f32 1e-05, %v947_v63  ;;  %1355 = vmatprep.subr.mxu1 %v1260_v62 }
 0x128   :  { %1380 = vrsqrt.f32 %v948_v0 }
 0x12c   :  { %1353 = vmatmul.mubr.msk.f32.vlgmr.msra.gmra.mrb[2].mxu1 %vm134_vm2, %v165_v1 }
 0x12d   :  { %1356 = vmatpush3.msra.mxu1 %v1260_v62 }
 0x132   :  { %v1381_v2 = vpop.eup %1380 }
 0x133   :  { %v950_v3 = vmul.f32 %v1381_v2, %v934_v42  ;;  %v951_v4 = vmul.f32 %v1381_v2, %v935_v43 }
 0x135   :  { %v952_v5 = vmax.f32 %v950_v3, 0.0  ;;  %v953_v6 = vmax.f32 %v951_v4, 0.0 }
 0x137   :  { %1357 = vmatprep.mubr.msk.f32.mxu1 %vm134_vm2, %v952_v5 }
 0x138   :  { %1358 = vmatmul.mubr.msk.f32.vlgmr.msra.gmra.mrb[2].mxu1 %vm134_vm2, %v953_v6 }
 0x20b   :  { %v1359_v7 = vpop.f32.mrb[2].mxu1 }
 0x20c   :  { %v1212_v8 = vadd.f32 %v1359_v7, %v1263_v27  ;;  %v1193_v9 = vpop.f32.mrb[3].mxu1 }
 0x20d   :  { %v1211_v10 = vadd.f32 %v1263_v27, %v1193_v9 }
 0x20e   :  { %1214 = vst.msk [vmem:[%s1618_s11 + $0x8] sm:$0xff] %vm134_vm2, %v1212_v8 }
 0x20f   :  { %1213 = vst.msk [vmem:[%s1618_s11] sm:$0xff] %vm134_vm2, %v1211_v10 }

// kernel: _lambda_.3
= control target key start
LH: loop header
LB: loop body
LE: loop exit
PB: predicated region body
PF: predicated region fallthrough
CT: control target
= control target key end

     0   :  { %vm54_vm0 = vcmask 64512   ;;  %v1612_v3 = vmov 0.0   ;;  %vm1613_vm1 = vmmov 0   ;;  %s1879_s0 = inlined_call_operand.vmem [shape: f32[8,8], index: 0, kind: input, shape index: {}]   ;;  %s1880_s1 = inlined_call_operand.vmem [shape: f32[12,8], index: 1, kind: input, shape index: {}]   ;;  %s1881_s2 = inlined_call_operand.vmem [shape: f32[16,8], index: 2, kind: input, shape index: {}]   ;;  %s1882_s3 = inlined_call_operand.vmem [shape: f32[1,8,16], index: 3, kind: input, shape index: {}]   ;;  %s1883_s4 = inlined_call_operand.vmem [shape: f32[3,8,16], index: 4, kind: input, shape index: {}]   ;;  %s1884_s5 = inlined_call_operand.vmem [shape: f32[5,8,16], index: 5, kind: input, shape index: {}]   ;;  %s1885_s6 = inlined_call_operand.vmem [shape: f32[1,16], index: 6, kind: input, shape index: {}]   ;;  %s1886_s7 = inlined_call_operand.vmem [shape: f32[1,16], index: 7, kind: input, shape index: {}]   ;;  %s1887_s8 = inlined_call_operand.vmem [shape: f32[1,16], index: 8, kind: input, shape index: {}]   ;;  %s1888_s9 = inlined_call_operand.vmem [shape: f32[3,16,16], index: 9, kind: input, shape index: {}]   ;;  %s1889_s10 = inlined_call_operand.vmem [shape: f32[1,16], index: 10, kind: input, shape index: {}]   ;;  %s1890_s11 = inlined_call_operand.vmem [shape: f32[4,16,32], index: 11, kind: input, shape index: {}]   ;;  %s1891_s12 = inlined_call_operand.vmem [shape: f32[1,32], index: 12, kind: input, shape index: {}]   ;;  %s1892_s13 = inlined_call_operand.hbm [shape: f32[2,32], index: 13, kind: output, shape index: {}]  }
   0x1   :  { %v46_v0 = vld [vmem:[%s1882_s3] sm:$0xff]  ;;  %v1389_v2 = vld [vmem:[%s1883_s4 + $0x8] sm:$0xff]  ;;  %1463 = vmatprep.subr.mxu0 %v1612_v3  ;;  %1465 = vmatprep.mubr.msk.f32.mxu0 %vm1613_vm1, %v1612_v3  ;;  %v1392_v6 = vld [vmem:[%s1883_s4 + $0x10] sm:$0xff] }
   0x2   :  { %v45_v1 = vld [vmem:[%s1879_s0] sm:$0xff]  ;;  %1464 = vmatpush3.msra.mxu0 %v46_v0  ;;  %1468 = vmatprep.subr.mxu1 %v1612_v3  ;;  %v1395_v9 = vld [vmem:[%s1884_s5 + $0x8] sm:$0xff] }
   0x3   :  { %v154_v4 = vld [vmem:[%s1880_s1 + $0x2] sm:$0xff]  ;;  %1466 = vmatmul.mubr.msk.f32.vlgmr.msra.gmra.mrb[0].mxu0 %vm54_vm0, %v45_v1  ;;  %1469 = vmatpush3.msra.mxu1 %v1389_v2 }
   0x4   :  { %v153_v5 = vld [vmem:[%s1883_s4] sm:$0xff]  ;;  %1470 = vmatprep.mubr.msk.f32.mxu1 %vm1613_vm1, %v1612_v3  ;;  %1473 = vmatprep.subr.mxu0 %v1612_v3 }
   0x5   :  { %v152_v7 = vld [vmem:[%s1880_s1] sm:$0xff]  ;;  %1471 = vmatmul.mubr.msk.f32.vlgmr.msra.gmra.mrb[0].mxu1 %vm54_vm0, %v154_v4  ;;  %1474 = vmatpush3.msra.mxu0 %v153_v5 }
   0x6   :  { %1478 = vmatprep.subr.mxu1 %v1612_v3  ;;  %1475 = vmatprep.mubr.msk.f32.mxu0 %vm1613_vm1, %v1612_v3  ;;  %v303_v8 = vld [vmem:[%s1880_s1 + $0x4] sm:$0xff] }
   0x7   :  { %18 = vsyncpa [#allocation3], 0  ;;  %1479 = vmatpush3.msra.mxu1 %v1392_v6  ;;  %1476 = vmatmul.mubr.msk.f32.vlgmr.msra.gmra.mrb[2].mxu0 %vm54_vm0, %v152_v7  ;;  %v411_v10 = vld [vmem:[%s1884_s5] sm:$0xff]  ;;  %v1398_v13 = vld [vmem:[%s1884_s5 + $0x10] sm:$0xff]  ;;  %v1614_v22 = vmov 0.0|0.0   ;;  %vm128_vm2 = vcmask 130048  }
   0x8   :  { %1480 = vmatprep.mubr.msk.f32.mxu1 %vm1613_vm1, %v1612_v3  ;;  %1483 = vmatprep.subr.mxu0 %v1612_v3  ;;  %v412_v11 = vld [vmem:[%s1881_s2 + $0x2] sm:$0xff]  ;;  %v1400_v14 = vld [vmem:[%s1884_s5 + $0x18] sm:$0xff]  ;;  %v1405_v23 = vld [vmem:[%s1888_s9 + $0x10] sm:$0xff]  ;;  %s1615_s1 = smov [#allocation2]   ;;  %vm1371_vm3 = vcmask 254976  }
   0x9   :  { %1481 = vmatmul.mubr.msk.f32.vlgmr.msra.gmra.mrb[2].mxu1 %vm54_vm0, %v303_v8  ;;  %1484 = vmatpush3.msra.mxu0 %v1395_v9  ;;  %v410_v12 = vld [vmem:[%s1881_s2] sm:$0xff]  ;;  %v715_v18 = vld [vmem:[%s1881_s2 + $0x8] sm:$0xff]  ;;  %v1406_v24 = vld [vmem:[%s1888_s9 + $0x18] sm:$0xff]  ;;  %s1379_s27 = sshll.u32 %s1615_s1, 4  ;;  %s1380_s27 = int_to_ptr.vmem [resolvable:$true] %s1379_s27 }
   0xa   :  { %1488 = vmatprep.subr.mxu1 %v1612_v3  ;;  %1485 = vmatprep.mubr.msk.f32.mxu0 %vm1613_vm1, %v1612_v3  ;;  %v561_v15 = vld [vmem:[%s1881_s2 + $0x4] sm:$0xff]  ;;  %v1558_v25 = vpack.c.bf16 %v1406_v24, %v1405_v23  ;;  %v1387_v26 = vld [vmem:[%s1885_s6] ss:$0 sm:$0xff]  ;;  %s1588_s28 = scalar_lea.vmem %s1380_s27, 32  ;;  %p1593_p1 = scmp.lt.s32.totalorder %s1380_s27, %s1380_s27 }
   0xb   :  { %1489 = vmatpush3.msra.mxu1 %v411_v10  ;;  %1486 = vmatmul.mubr.msk.f32.vlgmr.msra.gmra.mrb[4].mxu0 %vm54_vm0, %v412_v11  ;;  %v1402_v16 = vld [vmem:[%s1884_s5 + $0x20] sm:$0xff]  ;;  %v823_v20 = vld [vmem:[%s1888_s9 + $0x8] sm:$0xff]  ;;  %p1589_p0 = scmp.ne.s32.totalorder %s1380_s27, %s1588_s28  ;;  %p1594_p2 = scmp.lt.s32.totalorder %s1588_s28, %s1588_s28 }
   0xc   :  { %1490 = vmatprep.mubr.msk.f32.mxu1 %vm1613_vm1, %v1612_v3  ;;  %1493 = vmatprep.subr.mxu0 %v1612_v3  ;;  %v638_v17 = vld [vmem:[%s1881_s2 + $0x6] sm:$0xff]  ;;  %v1394_v39 = vld [vmem:[%s1886_s7] ss:$0 sm:$0xff] }
   0xd   :  { %1491 = vmatmul.mubr.msk.f32.vlgmr.msra.gmra.mrb[4].mxu1 %vm54_vm0, %v410_v12  ;;  %1494 = vmatpush3.msra.mxu0 %v1398_v13  ;;  %v822_v19 = vld [vmem:[%s1888_s9] sm:$0xff]  ;;  %p1595_p3 = por %p1594_p2, %p1593_p1 }
   0xe   :  { %1498 = vmatprep.subr.mxu1 %v1612_v3  ;;  %1495 = vmatprep.mubr.msk.f32.mxu0 %vm1613_vm1, %v1612_v3  ;;  %v1561_v21 = vpack.c.bf16 %v823_v20, %v822_v19  ;;  %v1404_v0 = vld [vmem:[%s1887_s8] ss:$0 sm:$0xff] }
   0xf   :  { %1499 = vmatpush3.msra.mxu1 %v1400_v14  ;;  %1496 = vmatmul.mubr.msk.f32.vlgmr.msra.gmra.mrb[6].mxu0 %vm54_vm0, %v561_v15  ;;  %p1596_p4 = pnand %p1595_p3, %p1589_p0 }
  0x10   :  { %1503 = vmatprep.subr.mxu0 %v1612_v3  ;;  %1500 = vmatprep.mubr.msk.f32.mxu1 %vm1613_vm1, %v1612_v3 }
  0x11   :  { %1504 = vmatpush3.msra.mxu0 %v1402_v16  ;;  %1501 = vmatmul.mubr.msk.f32.vlgmr.msra.gmra.mrb[6].mxu1 %vm54_vm0, %v638_v17 }
  0x12   :  { %1505 = vmatprep.mubr.msk.f32.mxu0 %vm1613_vm1, %v1612_v3  ;;  %1512 = vmatprep.mubr.msk.f32.mxu1 %vm1613_vm1, %v1612_v3 }
  0x13   :  { %1506 = vmatmul.mubr.msk.f32.vlgmr.msra.gmra.mrb[8].mxu0 %vm54_vm0, %v715_v18  ;;  %1560 = vmatprep.subr.bf16.mxu0 %v1614_v22 }
  0x14   :  { %1519 = vmatprep.mubr.msk.f32.mxu0 %vm1613_vm1, %v1612_v3  ;;  %1557 = vmatprep.subr.bf16.mxu1 %v1614_v22 }
  0x15   :  { %1562 = vmatpush3.bf16.msra.mxu0 %v1561_v21  ;;  %1559 = vmatpush3.bf16.msra.mxu1 %v1558_v25 }
  0x16   :  { %1566 = vmatprep.subr.bf16.mxu0 %v1614_v22  ;;  %1563 = vmatprep.subr.bf16.mxu1 %v1614_v22 }
  0xd6   :  { %v124_v27 = vpop.f32.mrb[0].mxu0 }
  0xd7   :  { %v125_v28 = vadd.f32 %v1387_v26, %v124_v27  ;;  %v1467_v29 = vpop.f32.mrb[1].mxu0 }
  0xd8   :  { %v226_v30 = vpop.f32.mrb[0].mxu1 }
  0xd9   :  { %v129_v31 = vsel %vm128_vm2, %v125_v28, 0.0  ;;  %v1472_v32 = vpop.f32.mrb[1].mxu1 }
  0xda   :  { %v130_v33 = vrot.slane %v129_v31, 4  ;;  %v299_v34 = vpop.f32.mrb[2].mxu0 }
  0xdb   :  { %v300_v35 = vadd.f32 %v299_v34, %v226_v30  ;;  %v1477_v36 = vpop.f32.mrb[3].mxu0 }
  0xdc   :  { %v131_v37 = vadd.f32 %v130_v33, %v129_v31  ;;  %v375_v38 = vpop.f32.mrb[2].mxu1 }
  0xdd   :  { %v379_v40 = vadd.f32 %v375_v38, %v300_v35  ;;  %v1482_v41 = vpop.f32.mrb[3].mxu1 }
  0xde   :  { %v132_v42 = vrot.slane %v131_v37, 2  ;;  %v484_v43 = vpop.f32.mrb[4].mxu0 }
  0xdf   :  { %v387_v44 = vadd.f32 %v1394_v39, %v379_v40  ;;  %v1487_v45 = vpop.f32.mrb[5].mxu0 }
  0xe0   :  { %v133_v46 = vadd.f32 %v132_v42, %v131_v37  ;;  %v557_v47 = vpop.f32.mrb[4].mxu1 }
  0xe1   :  { %v388_v48 = vsel %vm128_vm2, %v387_v44, 0.0  ;;  %v558_v49 = vadd.f32 %v557_v47, %v484_v43  ;;  %v1492_v50 = vpop.f32.mrb[5].mxu1 }
  0xe2   :  { %v134_v51 = vrot.slane %v133_v46, 1  ;;  %v389_v52 = vrot.slane %v388_v48, 4  ;;  %v633_v53 = vpop.f32.mrb[6].mxu0 }
  0xe3   :  { %v637_v54 = vadd.f32 %v633_v53, %v558_v49  ;;  %v1497_v55 = vpop.f32.mrb[7].mxu0 }
  0xe4   :  { %v135_v56 = vadd.f32 %v134_v51, %v133_v46  ;;  %v390_v57 = vadd.f32 %v389_v52, %v388_v48  ;;  %v710_v58 = vpop.f32.mrb[6].mxu1  ;;  %v1410_v55 = vld [vmem:[%s1888_s9 + $0x28] sm:$0xff] }
  0xe5   :  { %v714_v59 = vadd.f32 %v710_v58, %v637_v54  ;;  %v1502_v60 = vpop.f32.mrb[7].mxu1  ;;  %v1409_v54 = vld [vmem:[%s1888_s9 + $0x20] sm:$0xff] }
  0xe6   :  { %v137_v61 = vmul.f32 0.125, %v135_v56  ;;  %v391_v62 = vrot.slane %v390_v57, 2  ;;  %v787_v63 = vpop.f32.mrb[8].mxu0  ;;  %v1564_v58 = vpack.c.bf16 %v1410_v55, %v1409_v54 }
  0xe7   :  { %v791_v1 = vadd.f32 %v787_v63, %v714_v59  ;;  %v1507_v2 = vpop.f32.mrb[9].mxu0  ;;  %v1058_v63 = vld [vmem:[%s1890_s11] sm:$0xff] }
  0xe8   :  { %v138_v4 = vsub.f32 %v125_v28, %v137_v61  ;;  %v392_v5 = vadd.f32 %v391_v62, %v390_v57  ;;  %v1413_v2 = vld [vmem:[%s1890_s11 + $0x10] sm:$0xff] }
  0xe9   :  { %v799_v6 = vadd.f32 %v1404_v0, %v791_v1  ;;  %v1059_v0 = vld [vmem:[%s1890_s11 + $0x8] sm:$0xff] }
  0xea   :  { %v139_v7 = vmul.f32 %v138_v4, %v138_v4  ;;  %v393_v8 = vrot.slane %v392_v5, 1  ;;  %v1570_v1 = vpack.c.bf16 %v1059_v0, %v1058_v63 }
  0xeb   :  { %v800_v9 = vsel %vm128_vm2, %v799_v6, 0.0 }
  0xec   :  { %v140_v10 = vsel %vm128_vm2, %v139_v7, 0.0  ;;  %v394_v11 = vadd.f32 %v393_v8, %v392_v5  ;;  %v801_v12 = vrot.slane %v800_v9, 4 }
  0xed   :  { %v141_v13 = vrot.slane %v140_v10, 4 }
  0xee   :  { %v395_v14 = vmul.f32 0.125, %v394_v11  ;;  %v802_v15 = vadd.f32 %v801_v12, %v800_v9  ;;  %v1420_v11 = vld [vmem:[%s1890_s11 + $0x30] sm:$0xff]  ;;  %v1421_v12 = vld [vmem:[%s1890_s11 + $0x38] sm:$0xff] }
  0xef   :  { %v142_v16 = vadd.f32 %v141_v13, %v140_v10 }
  0xf0   :  { %v396_v17 = vsub.f32 %v387_v44, %v395_v14  ;;  %v803_v18 = vrot.slane %v802_v15, 2  ;;  %v1412_v14 = vld [vmem:[%s1889_s10] ss:$0 sm:$0xff] }
  0xf1   :  { %v143_v19 = vrot.slane %v142_v16, 2 }
  0xf2   :  { %v397_v20 = vmul.f32 %v396_v17, %v396_v17  ;;  %v804_v21 = vadd.f32 %v803_v18, %v802_v15  ;;  %v1576_v18 = vpack.c.bf16 %v1421_v12, %v1420_v11 }
  0xf3   :  { %v144_v23 = vadd.f32 %v143_v19, %v142_v16  ;;  %v1417_v16 = vld [vmem:[%s1890_s11 + $0x20] sm:$0xff] }
  0xf4   :  { %v398_v24 = vsel %vm128_vm2, %v397_v20, 0.0  ;;  %v805_v25 = vrot.slane %v804_v21, 1 }
  0xf5   :  { %v145_v26 = vrot.slane %v144_v23, 1  ;;  %v399_v27 = vrot.slane %v398_v24, 4 }
  0xf6   :  { %v806_v28 = vadd.f32 %v805_v25, %v804_v21 }
  0xf7   :  { %v146_v29 = vadd.f32 %v145_v26, %v144_v23  ;;  %v400_v30 = vadd.f32 %v399_v27, %v398_v24 }
  0xf8   :  { %v807_v31 = vmul.f32 0.125, %v806_v28 }
  0xf9   :  { %v147_v32 = vmul.f32 0.125, %v146_v29  ;;  %v401_v33 = vrot.slane %v400_v30, 2 }
  0xfa   :  { %v808_v34 = vsub.f32 %v799_v6, %v807_v31 }
  0xfb   :  { %v148_v35 = vadd.f32 1e-05, %v147_v32  ;;  %v402_v36 = vadd.f32 %v401_v33, %v400_v30 }
  0xfc   :  { %v809_v37 = vmul.f32 %v808_v34, %v808_v34 }
  0xfd   :  { %1582 = vrsqrt.f32 %v148_v35  ;;  %v403_v38 = vrot.slane %v402_v36, 1  ;;  %v1423_v35 = vld [vmem:[%s1891_s12] ss:$0 sm:$0xff] }
  0xfe   :  { %v810_v39 = vsel %vm128_vm2, %v809_v37, 0.0 }
  0xff   :  { %v404_v40 = vadd.f32 %v403_v38, %v402_v36  ;;  %v811_v41 = vrot.slane %v810_v39, 4 }
 0x101   :  { %v405_v42 = vmul.f32 0.125, %v404_v40  ;;  %v812_v43 = vadd.f32 %v811_v41, %v810_v39 }
 0x103   :  { %v406_v44 = vadd.f32 1e-05, %v405_v42  ;;  %v813_v45 = vrot.slane %v812_v43, 2 }
 0x105   :  { %1584 = vrsqrt.f32 %v406_v44  ;;  %v814_v46 = vadd.f32 %v813_v45, %v812_v43 }
 0x107   :  { %v1583_v47 = vpop.eup %1582  ;;  %v815_v48 = vrot.slane %v814_v46, 1 }
 0x108   :  { %v150_v49 = vmul.f32 %v1583_v47, %v138_v4  ;;  %v1414_v4 = vld [vmem:[%s1890_s11 + $0x18] sm:$0xff] }
 0x109   :  { %v816_v50 = vadd.f32 %v815_v48, %v814_v46  ;;  %v1567_v5 = vpack.c.bf16 %v1414_v4, %v1413_v2 }
 0x10a   :  { %v151_v51 = vmax.f32 %v150_v49, 0.0 }
 0x10b   :  { %v817_v52 = vmul.f32 0.125, %v816_v50 }
 0x10c   :  { %1520 = vmatmul.mubr.msk.f32.vlgmr.msra.gmra.mrb[10].mxu0 %vm128_vm2, %v151_v51 }
 0x10d   :  { %v818_v53 = vadd.f32 1e-05, %v817_v52  ;;  %1533 = vmatprep.mubr.msk.f32.mxu0 %vm1613_vm1, %v1612_v3  ;;  %1568 = vmatpush3.bf16.msra.mxu0 %v1567_v5 }
 0x10e   :  { %1572 = vmatprep.subr.bf16.mxu0 %v1614_v22 }
 0x10f   :  { %v1585_v56 = vpop.eup %1584  ;;  %1586 = vrsqrt.f32 %v818_v53 }
 0x110   :  { %v408_v57 = vmul.f32 %v1585_v56, %v396_v17  ;;  %v1418_v17 = vld [vmem:[%s1890_s11 + $0x28] sm:$0xff] }
 0x111   :  { %v1573_v20 = vpack.c.bf16 %v1418_v17, %v1417_v16 }
 0x112   :  { %v409_v59 = vmax.f32 %v408_v57, 0.0 }
 0x114   :  { %1513 = vmatmul.mubr.msk.f32.vlgmr.msra.gmra.mrb[8].mxu1 %vm128_vm2, %v409_v59 }
 0x115   :  { %1565 = vmatpush3.bf16.msra.mxu1 %v1564_v58  ;;  %1526 = vmatprep.mubr.msk.f32.mxu1 %vm1613_vm1, %v1612_v3 }
 0x116   :  { %1569 = vmatprep.subr.bf16.mxu1 %v1614_v22 }
 0x119   :  { %v1587_v60 = vpop.eup %1586 }
 0x11a   :  { %v820_v61 = vmul.f32 %v1587_v60, %v808_v34 }
 0x11c   :  { %v821_v62 = vmax.f32 %v820_v61, 0.0 }
 0x11e   :  { %1527 = vmatmul.mubr.msk.f32.vlgmr.msra.gmra.mrb[10].mxu1 %vm128_vm2, %v821_v62 }
 0x11f   :  { %1540 = vmatprep.mubr.msk.f32.mxu1 %vm1613_vm1, %v1612_v3  ;;  %1571 = vmatpush3.bf16.msra.mxu1 %v1570_v1 }
 0x120   :  { %1575 = vmatprep.subr.bf16.mxu1 %v1614_v22 }
 0x1df   :  { %v969_v6 = vpop.f32.mrb[10].mxu0 }
 0x1e0   :  { %v1521_v7 = vpop.f32.mrb[11].mxu0 }
 0x1e7   :  { %v896_v8 = vpop.f32.mrb[8].mxu1 }
 0x1e8   :  { %v970_v9 = vadd.f32 %v969_v6, %v896_v8  ;;  %v1514_v10 = vpop.f32.mrb[9].mxu1 }
 0x1f1   :  { %v1045_v13 = vpop.f32.mrb[10].mxu1 }
 0x1f2   :  { %v1049_v15 = vadd.f32 %v1045_v13, %v970_v9  ;;  %v1528_v22 = vpop.f32.mrb[11].mxu1 }
 0x1f4   :  { %v1057_v19 = vadd.f32 %v1412_v14, %v1049_v15 }
 0x1f6   :  { %v1064_v21 = vrot.slane %v1057_v19, 2  ;;  %1541 = vmatmul.mubr.msk.f32.vlgmr.msra.gmra.mrb[12].mxu1 %vm128_vm2, %v1057_v19  ;;  %v1289_v23 = vrot.slane %v1057_v19, 6  ;;  %v1212_v24 = vrot.slane %v1057_v19, 4 }
 0x1f7   :  { %1577 = vmatpush3.bf16.msra.mxu1 %v1576_v18  ;;  %1554 = vmatprep.mubr.msk.f32.mxu1 %vm1613_vm1, %v1612_v3 }
 0x1f8   :  { %1534 = vmatmul.mubr.msk.f32.vlgmr.msra.gmra.mrb[12].mxu0 %vm128_vm2, %v1064_v21 }
 0x1f9   :  { %1574 = vmatpush3.bf16.msra.mxu0 %v1573_v20  ;;  %1547 = vmatprep.mubr.msk.f32.mxu0 %vm1613_vm1, %v1612_v3 }
 0x1fa   :  { %1555 = vmatmul.mubr.msk.f32.vlgmr.msra.gmra.mrb[14].mxu1 %vm128_vm2, %v1289_v23 }
 0x1fc   :  { %1548 = vmatmul.mubr.msk.f32.vlgmr.msra.gmra.mrb[14].mxu0 %vm128_vm2, %v1212_v24 }
 0x2c9   :  { %v1205_v25 = vpop.f32.mrb[12].mxu1 }
 0x2ca   :  { %v1542_v26 = vpop.f32.mrb[13].mxu1 }
 0x2cb   :  { %v1133_v27 = vpop.f32.mrb[12].mxu0 }
 0x2cc   :  { %v1206_v28 = vadd.f32 %v1205_v25, %v1133_v27  ;;  %v1535_v29 = vpop.f32.mrb[13].mxu0 }
 0x2cd   :  { %v1358_v30 = vpop.f32.mrb[14].mxu1 }
 0x2ce   :  { %v1556_v31 = vpop.f32.mrb[15].mxu1 }
 0x2cf   :  { %v1281_v32 = vpop.f32.mrb[14].mxu0 }
 0x2d0   :  { %v1285_v33 = vadd.f32 %v1281_v32, %v1206_v28  ;;  %v1549_v34 = vpop.f32.mrb[15].mxu0 }
 0x2d2   :  { %v1362_v3 = vadd.f32 %v1358_v30, %v1285_v33 }
 0x2d4   :  { %v1370_v36 = vadd.f32 %v1423_v35, %v1362_v3 }
 0x2d6   :  { %1372 = vst.msk [vmem:[#allocation2] sm:$0x3] %vm1371_vm3, %v1370_v36 }
 0x2d7   :  { %1599 = shalt.err (!%p1596_p4)
}
 0x2d8   :  { %s1600_s8 = scalar_lea.hbm %s1892_s13, 32 }
 0x2d9   :  { %p1601_p5 = scmp.ne.s32.totalorder %s1892_s13, %s1600_s8  ;;  %p1604_p6 = scmp.lt.u32.totalorder %s1600_s8, %s1892_s13 }
 0x2db   :  { %p1606_p7 = pnand %p1604_p6, %p1601_p5 }
 0x2dd   :  { %1609 = shalt.err (!%p1606_p7)
}
 0x2de   :  { %1382 = dma.vmem_to_hbm [thread:$0]  %s1380_s27, 32, %s1892_s13, [#allocation3]  }
 0x2df   :  { %1610 = dma.done.wait [#allocation3], 32  }
 0x2e0   :  { %1611 = vsyncadd [#allocation3], 4294967264 }
 0x2e1   :  { %1386 = vsyncpa [#allocation3], 1 }

</bundles_post_ra>
